<compile_context>
chip_gen: v5e
topology: v5e:2x2
jax: 0.10.0
libtpu: 0.0.40
codegen_flags: <defaults>
</compile_context>

<pallas_src>
import jax
import jax.numpy as jnp
import numpy as np
from jax.experimental import pallas as pl
from jax.experimental.pallas import tpu as pltpu


def lstm_classifier_kernel(x_ref, mask_ref, wih_ref, whh_ref, b_ref,
                           fcw_ref, fcb_ref, out_ref):
    # x_ref:    (T*B, D)  f32   time-major rows: row index = t*B + b
    # mask_ref: (T, B, H) f32   1.0 while t < lengths[b], else 0.0
    # wih_ref:  (D, 4H)   bf16  fused gates, order [i, f, o, g]
    # whh_ref:  (H, 4H)   bf16
    # b_ref:    (1, 4H)   f32   (b_ih + b_hh)
    # fcw_ref:  (H, C)    f32
    # fcb_ref:  (1, C)    f32
    # out_ref:  (B, C)    f32
    T, B, H = mask_ref.shape

    # Hoist weight/bias loads out of the recurrence.
    wih = wih_ref[...]          # (D, 4H) bf16
    whh = whh_ref[...]          # (H, 4H) bf16
    b = b_ref[...]              # (1, 4H) f32

    # Single batched input projection for all timesteps; fully independent of
    # h, so the scheduler can overlap it with the first recurrence steps.
    xw_all = jnp.dot(x_ref[...].astype(wih.dtype), wih,
                     preferred_element_type=jnp.float32) + b        # (T*B, 4H)
    # Per-step slices taken up front (static slices, off the serial chain).
    xw = [xw_all[t * B:(t + 1) * B, :] for t in range(T)]           # T x (B, 4H)

    # Freeze masks already broadcast to (B, H); the compares are hoisted too,
    # so the loop body only does a select per state.
    masks = mask_ref[...]                                            # (T, B, H)
    keep = [masks[t] != 0.0 for t in range(T)]                       # T x (B, H) bool

    h = jnp.zeros((B, H), jnp.float32)
    c = jnp.zeros((B, H), jnp.float32)

    # Fully unrolled recurrence; per step: one fused (B, 4H) bf16 matmul with
    # f32 accumulation, one whole-block sigmoid, one whole-block tanh.
    for t in range(T):
        gates = xw[t] + jnp.dot(h.astype(whh.dtype), whh,
                                preferred_element_type=jnp.float32)  # (B, 4H) f32
        # Whole-vreg activations (avoid the 3H = 192-lane mid-vreg split).
        sig = jax.nn.sigmoid(gates)
        tnh = jnp.tanh(gates)
        i_g = sig[:, :H]
        f_g = sig[:, H:2 * H]
        o_g = sig[:, 2 * H:3 * H]
        g_g = tnh[:, 3 * H:]

        c_new = f_g * c + i_g * g_g
        h_new = o_g * jnp.tanh(c_new)

        # pack_padded_sequence semantics: freeze h/c once t >= length, so the
        # final h equals hn[-1] of the packed LSTM.
        h = jnp.where(keep[t], h_new, h)
        c = jnp.where(keep[t], c_new, c)

    # fc(hn[-1])  (C=2: the masked partial store is negligible; pad/scratch to
    # a 128-lane-dense output only if the head ever widens).
    out_ref[...] = (jnp.dot(h, fcw_ref[...], preferred_element_type=jnp.float32)
                    + fcb_ref[...])


def lstm_classifier_forward(x, lengths, wih, whh, b, fcw, fcb):
    """x: (B, T, D); wih: (4, D, H), whh: (4, H, H), b: (4, 1, H) in PyTorch
    gate order [i, f, g, o]; fcw: (H, C), fcb: (1, C)."""
    B, T, D = x.shape
    H = whh.shape[1]
    C = fcw.shape[1]

    # Restack [i, f, g, o] -> [i, f, o, g] and fuse along the output dim so the
    # per-step matmul result (B, 4H) is lane-dense; cast weights to bf16
    # (MXU-native single-pass, half the weight streaming). Bias stays f32.
    perm = (0, 1, 3, 2)
    wih_all = jnp.concatenate([wih[p] for p in perm], axis=1).astype(jnp.bfloat16)
    whh_all = jnp.concatenate([whh[p] for p in perm], axis=1).astype(jnp.bfloat16)
    b_all = jnp.concatenate([b[p] for p in perm], axis=1)            # (1, 4H) f32

    # Time-major, flattened x so the kernel's batched projection slices
    # contiguous (B, 4H) rows per step. Pure wrapper-side layout plumbing.
    x_tm = jnp.transpose(x, (1, 0, 2)).reshape(T * B, D)

    # Precompute the packed-sequence freeze masks, already broadcast to (B, H),
    # so no iota/compare/broadcast runs on the kernel's serial chain.
    t_iota = jnp.arange(T, dtype=jnp.int32).reshape(T, 1, 1)
    valid = (t_iota < lengths.astype(jnp.int32).reshape(1, B, 1)).astype(jnp.float32)
    masks = jnp.broadcast_to(valid, (T, B, H))                        # (T, B, H) f32

    return pl.pallas_call(
        lstm_classifier_kernel,
        out_shape=jax.ShapeDtypeStruct((B, C), jnp.float32),
        in_specs=[pl.BlockSpec(memory_space=pltpu.MemorySpace.VMEM)] * 7,
        out_specs=pl.BlockSpec(memory_space=pltpu.MemorySpace.VMEM),
    )(x_tm, masks, wih_all, whh_all, b_all, fcw, fcb)


def reference_forward(x, lengths, wih, whh, b, fcw, fcb):
    """Pure-JAX f32 reference with identical masked-recurrence semantics
    (PyTorch gate order [i, f, g, o])."""
    B, T, D = x.shape
    H = whh.shape[1]
    h = jnp.zeros((B, H), jnp.float32)
    c = jnp.zeros((B, H), jnp.float32)
    for t in range(T):
        x_t = x[:, t, :]
        i = jax.nn.sigmoid(x_t @ wih[0] + h @ whh[0] + b[0])
        f = jax.nn.sigmoid(x_t @ wih[1] + h @ whh[1] + b[1])
        g = jnp.tanh(x_t @ wih[2] + h @ whh[2] + b[2])
        o = jax.nn.sigmoid(x_t @ wih[3] + h @ whh[3] + b[3])
        c_new = f * c + i * g
        h_new = o * jnp.tanh(c_new)
        valid = (t < lengths).reshape(B, 1)
        h = jnp.where(valid, h_new, h)
        c = jnp.where(valid, c_new, c)
    return h @ fcw + fcb


if __name__ == "__main__":
    # Module defaults: input_dim=3, hidden_dim=64, num_classes=2
    B, T, D, H, C = 2, 8, 3, 64, 2

    key = jax.random.PRNGKey(0)
    k = jax.random.split(key, 8)
    scale = 1.0 / np.sqrt(H)  # PyTorch nn.LSTM / nn.Linear uniform init scale

    x = jax.random.normal(k[0], (B, T, D), dtype=jnp.float32)
    lengths = jnp.array([T, 5], dtype=jnp.int32)  # padded sequences

    # LSTM params, PyTorch gate order [i, f, g, o], pre-transposed to (in, out)
    wih = jax.random.uniform(k[1], (4, D, H), jnp.float32, -scale, scale)
    whh = jax.random.uniform(k[2], (4, H, H), jnp.float32, -scale, scale)
    b_ih = jax.random.uniform(k[3], (4, 1, H), jnp.float32, -scale, scale)
    b_hh = jax.random.uniform(k[4], (4, 1, H), jnp.float32, -scale, scale)
    b = b_ih + b_hh

    # FC params: Linear(hidden_dim, num_classes), weight stored as (H, C)
    fcw = jax.random.uniform(k[5], (H, C), jnp.float32, -scale, scale)
    fcb = jax.random.uniform(k[6], (1, C), jnp.float32, -scale, scale)

    out = lstm_classifier_forward(x, lengths, wih, whh, b, fcw, fcb)
    out = jax.block_until_ready(out)

    # f32 reference; kernel uses bf16 weights -> allow small numeric drift.
    ref = reference_forward(x, lengths, wih, whh, b, fcw, fcb)
    np.testing.assert_allclose(np.asarray(out), np.asarray(ref),
                               rtol=2e-2, atol=2e-2)
    assert out.shape == (B, C)
    print("KERNEL_OK")
</pallas_src>

<mosaic_0001>
module attributes {stable_mosaic.version = 11 : i64} {
  func.func @lstm_classifier_kernel(%arg0: memref<16x3xf32, #tpu.memory_space<vmem>>, %arg1: memref<8x2x64xf32, #tpu.memory_space<vmem>>, %arg2: memref<3x256xbf16, #tpu.memory_space<vmem>>, %arg3: memref<64x256xbf16, #tpu.memory_space<vmem>>, %arg4: memref<1x256xf32, #tpu.memory_space<vmem>>, %arg5: memref<64x2xf32, #tpu.memory_space<vmem>>, %arg6: memref<1x2xf32, #tpu.memory_space<vmem>>, %arg7: memref<2x2xf32, #tpu.memory_space<vmem>>) attributes {dimension_semantics = [], scalar_prefetch = 0 : i64, scratch_operands = 0 : i64, tpu.core_type = #tpu.core_type<tc>} {
    %c0 = arith.constant 0 : index
    %c0_0 = arith.constant 0 : index
    %0 = vector.load %arg2[%c0, %c0_0] : memref<3x256xbf16, #tpu.memory_space<vmem>>, vector<3x256xbf16>
    %c0_1 = arith.constant 0 : index
    %c0_2 = arith.constant 0 : index
    %1 = vector.load %arg3[%c0_1, %c0_2] : memref<64x256xbf16, #tpu.memory_space<vmem>>, vector<64x256xbf16>
    %c0_3 = arith.constant 0 : index
    %c0_4 = arith.constant 0 : index
    %2 = vector.load %arg4[%c0_3, %c0_4] : memref<1x256xf32, #tpu.memory_space<vmem>>, vector<1x256xf32>
    %c0_5 = arith.constant 0 : index
    %c0_6 = arith.constant 0 : index
    %3 = vector.load %arg0[%c0_5, %c0_6] : memref<16x3xf32, #tpu.memory_space<vmem>>, vector<16x3xf32>
    %4 = arith.truncf %3 : vector<16x3xf32> to vector<16x3xbf16>
    %cst = arith.constant dense<0.000000e+00> : vector<16x256xf32>
    %5 = tpu.matmul %4, %0, %cst {dimension_numbers = #tpu.dot_dimension_numbers<[1], [0], [0], [1], [0, 0, 1, 1], [], []>} : vector<16x3xbf16>, vector<3x256xbf16>, vector<16x256xf32> -> vector<16x256xf32>
    %6 = vector.broadcast %2 : vector<1x256xf32> to vector<16x256xf32>
    %7 = arith.addf %5, %6 : vector<16x256xf32>
    %8 = vector.extract_strided_slice %7 {offsets = [0, 0], sizes = [2, 256], strides = [1, 1]} : vector<16x256xf32> to vector<2x256xf32>
    %9 = vector.extract_strided_slice %7 {offsets = [2, 0], sizes = [2, 256], strides = [1, 1]} : vector<16x256xf32> to vector<2x256xf32>
    %10 = vector.extract_strided_slice %7 {offsets = [4, 0], sizes = [2, 256], strides = [1, 1]} : vector<16x256xf32> to vector<2x256xf32>
    %11 = vector.extract_strided_slice %7 {offsets = [6, 0], sizes = [2, 256], strides = [1, 1]} : vector<16x256xf32> to vector<2x256xf32>
    %12 = vector.extract_strided_slice %7 {offsets = [8, 0], sizes = [2, 256], strides = [1, 1]} : vector<16x256xf32> to vector<2x256xf32>
    %13 = vector.extract_strided_slice %7 {offsets = [10, 0], sizes = [2, 256], strides = [1, 1]} : vector<16x256xf32> to vector<2x256xf32>
    %14 = vector.extract_strided_slice %7 {offsets = [12, 0], sizes = [2, 256], strides = [1, 1]} : vector<16x256xf32> to vector<2x256xf32>
    %15 = vector.extract_strided_slice %7 {offsets = [14, 0], sizes = [2, 256], strides = [1, 1]} : vector<16x256xf32> to vector<2x256xf32>
    %c0_7 = arith.constant 0 : index
    %c0_8 = arith.constant 0 : index
    %c0_9 = arith.constant 0 : index
    %16 = vector.load %arg1[%c0_7, %c0_8, %c0_9] : memref<8x2x64xf32, #tpu.memory_space<vmem>>, vector<8x2x64xf32>
    %17 = vector.extract_strided_slice %16 {offsets = [0, 0, 0], sizes = [1, 2, 64], strides = [1, 1, 1]} : vector<8x2x64xf32> to vector<1x2x64xf32>
    %18 = vector.shape_cast %17 : vector<1x2x64xf32> to vector<2x64xf32>
    %cst_10 = arith.constant 0.000000e+00 : f32
    %19 = vector.broadcast %cst_10 : f32 to vector<2x64xf32>
    %20 = arith.cmpf one, %18, %19 : vector<2x64xf32>
    %21 = vector.extract_strided_slice %16 {offsets = [1, 0, 0], sizes = [1, 2, 64], strides = [1, 1, 1]} : vector<8x2x64xf32> to vector<1x2x64xf32>
    %22 = vector.shape_cast %21 : vector<1x2x64xf32> to vector<2x64xf32>
    %cst_11 = arith.constant 0.000000e+00 : f32
    %23 = vector.broadcast %cst_11 : f32 to vector<2x64xf32>
    %24 = arith.cmpf one, %22, %23 : vector<2x64xf32>
    %25 = vector.extract_strided_slice %16 {offsets = [2, 0, 0], sizes = [1, 2, 64], strides = [1, 1, 1]} : vector<8x2x64xf32> to vector<1x2x64xf32>
    %26 = vector.shape_cast %25 : vector<1x2x64xf32> to vector<2x64xf32>
    %cst_12 = arith.constant 0.000000e+00 : f32
    %27 = vector.broadcast %cst_12 : f32 to vector<2x64xf32>
    %28 = arith.cmpf one, %26, %27 : vector<2x64xf32>
    %29 = vector.extract_strided_slice %16 {offsets = [3, 0, 0], sizes = [1, 2, 64], strides = [1, 1, 1]} : vector<8x2x64xf32> to vector<1x2x64xf32>
    %30 = vector.shape_cast %29 : vector<1x2x64xf32> to vector<2x64xf32>
    %cst_13 = arith.constant 0.000000e+00 : f32
    %31 = vector.broadcast %cst_13 : f32 to vector<2x64xf32>
    %32 = arith.cmpf one, %30, %31 : vector<2x64xf32>
    %33 = vector.extract_strided_slice %16 {offsets = [4, 0, 0], sizes = [1, 2, 64], strides = [1, 1, 1]} : vector<8x2x64xf32> to vector<1x2x64xf32>
    %34 = vector.shape_cast %33 : vector<1x2x64xf32> to vector<2x64xf32>
    %cst_14 = arith.constant 0.000000e+00 : f32
    %35 = vector.broadcast %cst_14 : f32 to vector<2x64xf32>
    %36 = arith.cmpf one, %34, %35 : vector<2x64xf32>
    %37 = vector.extract_strided_slice %16 {offsets = [5, 0, 0], sizes = [1, 2, 64], strides = [1, 1, 1]} : vector<8x2x64xf32> to vector<1x2x64xf32>
    %38 = vector.shape_cast %37 : vector<1x2x64xf32> to vector<2x64xf32>
    %cst_15 = arith.constant 0.000000e+00 : f32
    %39 = vector.broadcast %cst_15 : f32 to vector<2x64xf32>
    %40 = arith.cmpf one, %38, %39 : vector<2x64xf32>
    %41 = vector.extract_strided_slice %16 {offsets = [6, 0, 0], sizes = [1, 2, 64], strides = [1, 1, 1]} : vector<8x2x64xf32> to vector<1x2x64xf32>
    %42 = vector.shape_cast %41 : vector<1x2x64xf32> to vector<2x64xf32>
    %cst_16 = arith.constant 0.000000e+00 : f32
    %43 = vector.broadcast %cst_16 : f32 to vector<2x64xf32>
    %44 = arith.cmpf one, %42, %43 : vector<2x64xf32>
    %45 = vector.extract_strided_slice %16 {offsets = [7, 0, 0], sizes = [1, 2, 64], strides = [1, 1, 1]} : vector<8x2x64xf32> to vector<1x2x64xf32>
    %46 = vector.shape_cast %45 : vector<1x2x64xf32> to vector<2x64xf32>
    %cst_17 = arith.constant 0.000000e+00 : f32
    %47 = vector.broadcast %cst_17 : f32 to vector<2x64xf32>
    %48 = arith.cmpf one, %46, %47 : vector<2x64xf32>
    %cst_18 = arith.constant 0.000000e+00 : f32
    %49 = vector.broadcast %cst_18 : f32 to vector<2x64xf32>
    %cst_19 = arith.constant 0.000000e+00 : f32
    %50 = vector.broadcast %cst_19 : f32 to vector<2x64xf32>
    %51 = arith.truncf %49 : vector<2x64xf32> to vector<2x64xbf16>
    %cst_20 = arith.constant dense<0.000000e+00> : vector<2x256xf32>
    %52 = tpu.matmul %51, %1, %cst_20 {dimension_numbers = #tpu.dot_dimension_numbers<[1], [0], [0], [1], [0, 0, 1, 1], [], []>} : vector<2x64xbf16>, vector<64x256xbf16>, vector<2x256xf32> -> vector<2x256xf32>
    %53 = arith.addf %8, %52 : vector<2x256xf32>
    %54 = arith.negf %53 : vector<2x256xf32>
    %55 = math.exp %54 : vector<2x256xf32>
    %cst_21 = arith.constant 1.000000e+00 : f32
    %56 = vector.broadcast %cst_21 : f32 to vector<2x256xf32>
    %57 = arith.addf %56, %55 : vector<2x256xf32>
    %58 = arith.divf %56, %57 : vector<2x256xf32>
    %59 = math.tanh %53 : vector<2x256xf32>
    %60 = vector.extract_strided_slice %58 {offsets = [0, 0], sizes = [2, 64], strides = [1, 1]} : vector<2x256xf32> to vector<2x64xf32>
    %61 = vector.extract_strided_slice %58 {offsets = [0, 64], sizes = [2, 64], strides = [1, 1]} : vector<2x256xf32> to vector<2x64xf32>
    %62 = vector.extract_strided_slice %58 {offsets = [0, 128], sizes = [2, 64], strides = [1, 1]} : vector<2x256xf32> to vector<2x64xf32>
    %63 = vector.extract_strided_slice %59 {offsets = [0, 192], sizes = [2, 64], strides = [1, 1]} : vector<2x256xf32> to vector<2x64xf32>
    %64 = arith.mulf %61, %50 : vector<2x64xf32>
    %65 = arith.mulf %60, %63 : vector<2x64xf32>
    %66 = arith.addf %64, %65 : vector<2x64xf32>
    %67 = math.tanh %66 : vector<2x64xf32>
    %68 = arith.mulf %62, %67 : vector<2x64xf32>
    %69 = arith.select %20, %68, %49 : vector<2x64xi1>, vector<2x64xf32>
    %70 = arith.select %20, %66, %50 : vector<2x64xi1>, vector<2x64xf32>
    %71 = arith.truncf %69 : vector<2x64xf32> to vector<2x64xbf16>
    %cst_22 = arith.constant dense<0.000000e+00> : vector<2x256xf32>
    %72 = tpu.matmul %71, %1, %cst_22 {dimension_numbers = #tpu.dot_dimension_numbers<[1], [0], [0], [1], [0, 0, 1, 1], [], []>} : vector<2x64xbf16>, vector<64x256xbf16>, vector<2x256xf32> -> vector<2x256xf32>
    %73 = arith.addf %9, %72 : vector<2x256xf32>
    %74 = arith.negf %73 : vector<2x256xf32>
    %75 = math.exp %74 : vector<2x256xf32>
    %cst_23 = arith.constant 1.000000e+00 : f32
    %76 = vector.broadcast %cst_23 : f32 to vector<2x256xf32>
    %77 = arith.addf %76, %75 : vector<2x256xf32>
    %78 = arith.divf %76, %77 : vector<2x256xf32>
    %79 = math.tanh %73 : vector<2x256xf32>
    %80 = vector.extract_strided_slice %78 {offsets = [0, 0], sizes = [2, 64], strides = [1, 1]} : vector<2x256xf32> to vector<2x64xf32>
    %81 = vector.extract_strided_slice %78 {offsets = [0, 64], sizes = [2, 64], strides = [1, 1]} : vector<2x256xf32> to vector<2x64xf32>
    %82 = vector.extract_strided_slice %78 {offsets = [0, 128], sizes = [2, 64], strides = [1, 1]} : vector<2x256xf32> to vector<2x64xf32>
    %83 = vector.extract_strided_slice %79 {offsets = [0, 192], sizes = [2, 64], strides = [1, 1]} : vector<2x256xf32> to vector<2x64xf32>
    %84 = arith.mulf %81, %70 : vector<2x64xf32>
    %85 = arith.mulf %80, %83 : vector<2x64xf32>
    %86 = arith.addf %84, %85 : vector<2x64xf32>
    %87 = math.tanh %86 : vector<2x64xf32>
    %88 = arith.mulf %82, %87 : vector<2x64xf32>
    %89 = arith.select %24, %88, %69 : vector<2x64xi1>, vector<2x64xf32>
    %90 = arith.select %24, %86, %70 : vector<2x64xi1>, vector<2x64xf32>
    %91 = arith.truncf %89 : vector<2x64xf32> to vector<2x64xbf16>
    %cst_24 = arith.constant dense<0.000000e+00> : vector<2x256xf32>
    %92 = tpu.matmul %91, %1, %cst_24 {dimension_numbers = #tpu.dot_dimension_numbers<[1], [0], [0], [1], [0, 0, 1, 1], [], []>} : vector<2x64xbf16>, vector<64x256xbf16>, vector<2x256xf32> -> vector<2x256xf32>
    %93 = arith.addf %10, %92 : vector<2x256xf32>
    %94 = arith.negf %93 : vector<2x256xf32>
    %95 = math.exp %94 : vector<2x256xf32>
    %cst_25 = arith.constant 1.000000e+00 : f32
    %96 = vector.broadcast %cst_25 : f32 to vector<2x256xf32>
    %97 = arith.addf %96, %95 : vector<2x256xf32>
    %98 = arith.divf %96, %97 : vector<2x256xf32>
    %99 = math.tanh %93 : vector<2x256xf32>
    %100 = vector.extract_strided_slice %98 {offsets = [0, 0], sizes = [2, 64], strides = [1, 1]} : vector<2x256xf32> to vector<2x64xf32>
    %101 = vector.extract_strided_slice %98 {offsets = [0, 64], sizes = [2, 64], strides = [1, 1]} : vector<2x256xf32> to vector<2x64xf32>
    %102 = vector.extract_strided_slice %98 {offsets = [0, 128], sizes = [2, 64], strides = [1, 1]} : vector<2x256xf32> to vector<2x64xf32>
    %103 = vector.extract_strided_slice %99 {offsets = [0, 192], sizes = [2, 64], strides = [1, 1]} : vector<2x256xf32> to vector<2x64xf32>
    %104 = arith.mulf %101, %90 : vector<2x64xf32>
    %105 = arith.mulf %100, %103 : vector<2x64xf32>
    %106 = arith.addf %104, %105 : vector<2x64xf32>
    %107 = math.tanh %106 : vector<2x64xf32>
    %108 = arith.mulf %102, %107 : vector<2x64xf32>
    %109 = arith.select %28, %108, %89 : vector<2x64xi1>, vector<2x64xf32>
    %110 = arith.select %28, %106, %90 : vector<2x64xi1>, vector<2x64xf32>
    %111 = arith.truncf %109 : vector<2x64xf32> to vector<2x64xbf16>
    %cst_26 = arith.constant dense<0.000000e+00> : vector<2x256xf32>
    %112 = tpu.matmul %111, %1, %cst_26 {dimension_numbers = #tpu.dot_dimension_numbers<[1], [0], [0], [1], [0, 0, 1, 1], [], []>} : vector<2x64xbf16>, vector<64x256xbf16>, vector<2x256xf32> -> vector<2x256xf32>
    %113 = arith.addf %11, %112 : vector<2x256xf32>
    %114 = arith.negf %113 : vector<2x256xf32>
    %115 = math.exp %114 : vector<2x256xf32>
    %cst_27 = arith.constant 1.000000e+00 : f32
    %116 = vector.broadcast %cst_27 : f32 to vector<2x256xf32>
    %117 = arith.addf %116, %115 : vector<2x256xf32>
    %118 = arith.divf %116, %117 : vector<2x256xf32>
    %119 = math.tanh %113 : vector<2x256xf32>
    %120 = vector.extract_strided_slice %118 {offsets = [0, 0], sizes = [2, 64], strides = [1, 1]} : vector<2x256xf32> to vector<2x64xf32>
    %121 = vector.extract_strided_slice %118 {offsets = [0, 64], sizes = [2, 64], strides = [1, 1]} : vector<2x256xf32> to vector<2x64xf32>
    %122 = vector.extract_strided_slice %118 {offsets = [0, 128], sizes = [2, 64], strides = [1, 1]} : vector<2x256xf32> to vector<2x64xf32>
    %123 = vector.extract_strided_slice %119 {offsets = [0, 192], sizes = [2, 64], strides = [1, 1]} : vector<2x256xf32> to vector<2x64xf32>
    %124 = arith.mulf %121, %110 : vector<2x64xf32>
    %125 = arith.mulf %120, %123 : vector<2x64xf32>
    %126 = arith.addf %124, %125 : vector<2x64xf32>
    %127 = math.tanh %126 : vector<2x64xf32>
    %128 = arith.mulf %122, %127 : vector<2x64xf32>
    %129 = arith.select %32, %128, %109 : vector<2x64xi1>, vector<2x64xf32>
    %130 = arith.select %32, %126, %110 : vector<2x64xi1>, vector<2x64xf32>
    %131 = arith.truncf %129 : vector<2x64xf32> to vector<2x64xbf16>
    %cst_28 = arith.constant dense<0.000000e+00> : vector<2x256xf32>
    %132 = tpu.matmul %131, %1, %cst_28 {dimension_numbers = #tpu.dot_dimension_numbers<[1], [0], [0], [1], [0, 0, 1, 1], [], []>} : vector<2x64xbf16>, vector<64x256xbf16>, vector<2x256xf32> -> vector<2x256xf32>
    %133 = arith.addf %12, %132 : vector<2x256xf32>
    %134 = arith.negf %133 : vector<2x256xf32>
    %135 = math.exp %134 : vector<2x256xf32>
    %cst_29 = arith.constant 1.000000e+00 : f32
    %136 = vector.broadcast %cst_29 : f32 to vector<2x256xf32>
    %137 = arith.addf %136, %135 : vector<2x256xf32>
    %138 = arith.divf %136, %137 : vector<2x256xf32>
    %139 = math.tanh %133 : vector<2x256xf32>
    %140 = vector.extract_strided_slice %138 {offsets = [0, 0], sizes = [2, 64], strides = [1, 1]} : vector<2x256xf32> to vector<2x64xf32>
    %141 = vector.extract_strided_slice %138 {offsets = [0, 64], sizes = [2, 64], strides = [1, 1]} : vector<2x256xf32> to vector<2x64xf32>
    %142 = vector.extract_strided_slice %138 {offsets = [0, 128], sizes = [2, 64], strides = [1, 1]} : vector<2x256xf32> to vector<2x64xf32>
    %143 = vector.extract_strided_slice %139 {offsets = [0, 192], sizes = [2, 64], strides = [1, 1]} : vector<2x256xf32> to vector<2x64xf32>
    %144 = arith.mulf %141, %130 : vector<2x64xf32>
    %145 = arith.mulf %140, %143 : vector<2x64xf32>
    %146 = arith.addf %144, %145 : vector<2x64xf32>
    %147 = math.tanh %146 : vector<2x64xf32>
    %148 = arith.mulf %142, %147 : vector<2x64xf32>
    %149 = arith.select %36, %148, %129 : vector<2x64xi1>, vector<2x64xf32>
    %150 = arith.select %36, %146, %130 : vector<2x64xi1>, vector<2x64xf32>
    %151 = arith.truncf %149 : vector<2x64xf32> to vector<2x64xbf16>
    %cst_30 = arith.constant dense<0.000000e+00> : vector<2x256xf32>
    %152 = tpu.matmul %151, %1, %cst_30 {dimension_numbers = #tpu.dot_dimension_numbers<[1], [0], [0], [1], [0, 0, 1, 1], [], []>} : vector<2x64xbf16>, vector<64x256xbf16>, vector<2x256xf32> -> vector<2x256xf32>
    %153 = arith.addf %13, %152 : vector<2x256xf32>
    %154 = arith.negf %153 : vector<2x256xf32>
    %155 = math.exp %154 : vector<2x256xf32>
    %cst_31 = arith.constant 1.000000e+00 : f32
    %156 = vector.broadcast %cst_31 : f32 to vector<2x256xf32>
    %157 = arith.addf %156, %155 : vector<2x256xf32>
    %158 = arith.divf %156, %157 : vector<2x256xf32>
    %159 = math.tanh %153 : vector<2x256xf32>
    %160 = vector.extract_strided_slice %158 {offsets = [0, 0], sizes = [2, 64], strides = [1, 1]} : vector<2x256xf32> to vector<2x64xf32>
    %161 = vector.extract_strided_slice %158 {offsets = [0, 64], sizes = [2, 64], strides = [1, 1]} : vector<2x256xf32> to vector<2x64xf32>
    %162 = vector.extract_strided_slice %158 {offsets = [0, 128], sizes = [2, 64], strides = [1, 1]} : vector<2x256xf32> to vector<2x64xf32>
    %163 = vector.extract_strided_slice %159 {offsets = [0, 192], sizes = [2, 64], strides = [1, 1]} : vector<2x256xf32> to vector<2x64xf32>
    %164 = arith.mulf %161, %150 : vector<2x64xf32>
    %165 = arith.mulf %160, %163 : vector<2x64xf32>
    %166 = arith.addf %164, %165 : vector<2x64xf32>
    %167 = math.tanh %166 : vector<2x64xf32>
    %168 = arith.mulf %162, %167 : vector<2x64xf32>
    %169 = arith.select %40, %168, %149 : vector<2x64xi1>, vector<2x64xf32>
    %170 = arith.select %40, %166, %150 : vector<2x64xi1>, vector<2x64xf32>
    %171 = arith.truncf %169 : vector<2x64xf32> to vector<2x64xbf16>
    %cst_32 = arith.constant dense<0.000000e+00> : vector<2x256xf32>
    %172 = tpu.matmul %171, %1, %cst_32 {dimension_numbers = #tpu.dot_dimension_numbers<[1], [0], [0], [1], [0, 0, 1, 1], [], []>} : vector<2x64xbf16>, vector<64x256xbf16>, vector<2x256xf32> -> vector<2x256xf32>
    %173 = arith.addf %14, %172 : vector<2x256xf32>
    %174 = arith.negf %173 : vector<2x256xf32>
    %175 = math.exp %174 : vector<2x256xf32>
    %cst_33 = arith.constant 1.000000e+00 : f32
    %176 = vector.broadcast %cst_33 : f32 to vector<2x256xf32>
    %177 = arith.addf %176, %175 : vector<2x256xf32>
    %178 = arith.divf %176, %177 : vector<2x256xf32>
    %179 = math.tanh %173 : vector<2x256xf32>
    %180 = vector.extract_strided_slice %178 {offsets = [0, 0], sizes = [2, 64], strides = [1, 1]} : vector<2x256xf32> to vector<2x64xf32>
    %181 = vector.extract_strided_slice %178 {offsets = [0, 64], sizes = [2, 64], strides = [1, 1]} : vector<2x256xf32> to vector<2x64xf32>
    %182 = vector.extract_strided_slice %178 {offsets = [0, 128], sizes = [2, 64], strides = [1, 1]} : vector<2x256xf32> to vector<2x64xf32>
    %183 = vector.extract_strided_slice %179 {offsets = [0, 192], sizes = [2, 64], strides = [1, 1]} : vector<2x256xf32> to vector<2x64xf32>
    %184 = arith.mulf %181, %170 : vector<2x64xf32>
    %185 = arith.mulf %180, %183 : vector<2x64xf32>
    %186 = arith.addf %184, %185 : vector<2x64xf32>
    %187 = math.tanh %186 : vector<2x64xf32>
    %188 = arith.mulf %182, %187 : vector<2x64xf32>
    %189 = arith.select %44, %188, %169 : vector<2x64xi1>, vector<2x64xf32>
    %190 = arith.select %44, %186, %170 : vector<2x64xi1>, vector<2x64xf32>
    %191 = arith.truncf %189 : vector<2x64xf32> to vector<2x64xbf16>
    %cst_34 = arith.constant dense<0.000000e+00> : vector<2x256xf32>
    %192 = tpu.matmul %191, %1, %cst_34 {dimension_numbers = #tpu.dot_dimension_numbers<[1], [0], [0], [1], [0, 0, 1, 1], [], []>} : vector<2x64xbf16>, vector<64x256xbf16>, vector<2x256xf32> -> vector<2x256xf32>
    %193 = arith.addf %15, %192 : vector<2x256xf32>
    %194 = arith.negf %193 : vector<2x256xf32>
    %195 = math.exp %194 : vector<2x256xf32>
    %cst_35 = arith.constant 1.000000e+00 : f32
    %196 = vector.broadcast %cst_35 : f32 to vector<2x256xf32>
    %197 = arith.addf %196, %195 : vector<2x256xf32>
    %198 = arith.divf %196, %197 : vector<2x256xf32>
    %199 = math.tanh %193 : vector<2x256xf32>
    %200 = vector.extract_strided_slice %198 {offsets = [0, 0], sizes = [2, 64], strides = [1, 1]} : vector<2x256xf32> to vector<2x64xf32>
    %201 = vector.extract_strided_slice %198 {offsets = [0, 64], sizes = [2, 64], strides = [1, 1]} : vector<2x256xf32> to vector<2x64xf32>
    %202 = vector.extract_strided_slice %198 {offsets = [0, 128], sizes = [2, 64], strides = [1, 1]} : vector<2x256xf32> to vector<2x64xf32>
    %203 = vector.extract_strided_slice %199 {offsets = [0, 192], sizes = [2, 64], strides = [1, 1]} : vector<2x256xf32> to vector<2x64xf32>
    %204 = arith.mulf %201, %190 : vector<2x64xf32>
    %205 = arith.mulf %200, %203 : vector<2x64xf32>
    %206 = arith.addf %204, %205 : vector<2x64xf32>
    %207 = math.tanh %206 : vector<2x64xf32>
    %208 = arith.mulf %202, %207 : vector<2x64xf32>
    %209 = arith.select %48, %208, %189 : vector<2x64xi1>, vector<2x64xf32>
    %c0_36 = arith.constant 0 : index
    %c0_37 = arith.constant 0 : index
    %210 = vector.load %arg5[%c0_36, %c0_37] : memref<64x2xf32, #tpu.memory_space<vmem>>, vector<64x2xf32>
    %cst_38 = arith.constant dense<0.000000e+00> : vector<2x2xf32>
    %211 = tpu.matmul %209, %210, %cst_38 {dimension_numbers = #tpu.dot_dimension_numbers<[1], [0], [0], [1], [0, 0, 1, 1], [], []>} : vector<2x64xf32>, vector<64x2xf32>, vector<2x2xf32> -> vector<2x2xf32>
    %c0_39 = arith.constant 0 : index
    %c0_40 = arith.constant 0 : index
    %212 = vector.load %arg6[%c0_39, %c0_40] : memref<1x2xf32, #tpu.memory_space<vmem>>, vector<1x2xf32>
    %213 = vector.broadcast %212 : vector<1x2xf32> to vector<2x2xf32>
    %214 = arith.addf %211, %213 : vector<2x2xf32>
    %c0_41 = arith.constant 0 : index
    %c0_42 = arith.constant 0 : index
    %215 = vector.load %arg7[%c0_41, %c0_42] : memref<2x2xf32, #tpu.memory_space<vmem>>, vector<2x2xf32>
    tpu.vector_store %arg7[%c0_41, %c0_42], %214 {strides = array<i32>} : memref<2x2xf32, #tpu.memory_space<vmem>>, vector<2x2xf32>,
    return
  }
}

</mosaic_0001>

<bundles_post_ra>
// kernel: tpu_custom_call.1
= control target key start
LH: loop header
LB: loop body
LE: loop exit
PB: predicated region body
PF: predicated region fallthrough
CT: control target
= control target key end

     0   :  { %vm54_vm0 = vcmask 1040384   ;;  %vm55_vm1 = vcmask 1041408   ;;  %v1239_v7 = vmov 65535   ;;  %s1633_s0 = inlined_call_operand.vmem [shape: f32[16,3], index: 0, kind: input, shape index: {}]   ;;  %s1634_s1 = inlined_call_operand.vmem [shape: f32[8,2,64], index: 1, kind: input, shape index: {}]   ;;  %s1635_s2 = inlined_call_operand.vmem [shape: bf16[3,256], index: 2, kind: input, shape index: {}]   ;;  %s1636_s3 = inlined_call_operand.vmem [shape: bf16[64,256], index: 3, kind: input, shape index: {}]   ;;  %s1637_s4 = inlined_call_operand.vmem [shape: f32[1,256], index: 4, kind: input, shape index: {}]   ;;  %s1638_s5 = inlined_call_operand.vmem [shape: f32[64,2], index: 5, kind: input, shape index: {}]   ;;  %s1639_s6 = inlined_call_operand.vmem [shape: f32[1,2], index: 6, kind: input, shape index: {}]   ;;  %s1640_s7 = inlined_call_operand.hbm [shape: f32[2,2], index: 7, kind: output, shape index: {}]  }
   0x1   :  { %v1110_v0 = vld [vmem:[%s1636_s3 + $0x34] sm:$0xf]  ;;  %v1069_v1 = vld [vmem:[%s1636_s3 + $0x38] sm:$0xf0]  ;;  %v1108_v2 = vld [vmem:[%s1636_s3 + $0x24] sm:$0xf] }
   0x2   :  { %v1292_v3 = vor.u32 %v1110_v0, %v1069_v1  ;;  %v1061_v4 = vld [vmem:[%s1636_s3 + $0x28] sm:$0xf0]  ;;  %v28_v5 = vld [vmem:[%s1635_s2] sm:$0xf]  ;;  %v56_v8 = vsel %vm54_vm0, 4294967295, %v1239_v7 }
   0x3   :  { %47 = vst [vmem:[#allocation1] ss:$4 sm:$0xff] %v28_v5  ;;  %v1301_v6 = vor.u32 %v1108_v2, %v1061_v4  ;;  %v1106_v9 = vld [vmem:[%s1636_s3 + $0x14] sm:$0xf]  ;;  %v1053_v10 = vld [vmem:[%s1636_s3 + $0x18] sm:$0xf0] }
   0x4   :  { %167 = vmatpush.bf16.msra.mxu3 %v1292_v3  ;;  %v1067_v11 = vld [vmem:[%s1636_s3 + $0x30] sm:$0xf]  ;;  %v1111_v12 = vld [vmem:[%s1636_s3 + $0x34] sm:$0xf0]  ;;  %v1059_v13 = vld [vmem:[%s1636_s3 + $0x20] sm:$0xf]  ;;  %v1330_v19 = vor.u32 %v1106_v9, %v1053_v10 }
   0x5   :  { %v57_v14 = vsel %vm55_vm1, %v56_v8, 0  ;;  %v38_v15 = vld [vmem:[%s1633_s0] sm:$0xff]  ;;  %v39_v16 = vld [vmem:[%s1633_s0 + $0x8] sm:$0xff]  ;;  %v1324_v17 = vor.u32 %v1111_v12, %v1067_v11  ;;  %v1051_v22 = vld [vmem:[%s1636_s3 + $0x10] sm:$0xf] }
   0x6   :  { %v1109_v18 = vld [vmem:[%s1636_s3 + $0x24] sm:$0xf0]  ;;  %v1104_v20 = vld [vmem:[%s1636_s3 + $0x4] sm:$0xf]  ;;  %v1045_v21 = vld [vmem:[%s1636_s3 + $0x8] sm:$0xf0] }
   0x7   :  { %154 = vmatpush.bf16.msra.mxu2 %v1324_v17  ;;  %v1342_v23 = vor.u32 %v1109_v18, %v1059_v13  ;;  %v1107_v24 = vld [vmem:[%s1636_s3 + $0x14] sm:$0xf0] }
   0x8   :  { %168 = vmatpush.bf16.msra.mxu3 %v1301_v6 }
   0x9   :  { %12 = vsyncpa [#allocation3], 0  ;;  %v40_v29 = vpack.c.bf16 %v39_v16, %v38_v15  ;;  %v1348_v30 = vor.u32 %v1104_v20, %v1045_v21  ;;  %vm50_vm2 = vcmask 23552   ;;  %v1351_v31 = vor.u32 %v1107_v24, %v1051_v22  ;;  %v1043_v32 = vld [vmem:[%s1636_s3] sm:$0xf]  ;;  %s1241_s15 = smov 64  }
   0xa   :  { %v49_v25 = vld.sshfl [vmem:[#allocation1 + $0x8] sm:$0xff pattern:$0x73625140]  ;;  %v48_v26 = vld.sshfl [vmem:[#allocation1] sm:$0xff pattern:$0x73625140] }
   0xb   :  { %v60_v27 = vand.u32 %v57_v14, %v49_v25  ;;  %v58_v28 = vand.u32 %v57_v14, %v48_v26  ;;  %155 = vmatpush.bf16.msra.mxu2 %v1342_v23  ;;  %v1105_v33 = vld [vmem:[%s1636_s3 + $0x4] sm:$0xf0]  ;;  %v1240_v35 = vmov 0   ;;  %v1399_v36 = vld [vmem:[%s1637_s4] sm:$0x3]  ;;  %vm146_vm12 = vcmask 523264  }
   0xc   :  { %169 = vmatpush.bf16.msra.mxu3 %v1330_v19  ;;  %v1363_v34 = vor.u32 %v1105_v33, %v1043_v32  ;;  %v43_v37 = vperm.slane %v1399_v36, 1  ;;  %v42_v46 = vperm.slane %v1399_v36, 0  ;;  %v90_v18 = vld [vmem:[%s1634_s1] sm:$0x3]  ;;  %s1242_s20 = smov [#allocation2]  }
   0xd   :  { %83 = vmatpush.bf16.msra.mxu1 %v60_v27  ;;  %69 = vmatpush.bf16.msra.mxu0 %v58_v28  ;;  %vm98_vm11 = vcmp.ne.f32.partialorder %v90_v18, 0.0  ;;  %s1028_s21 = sshll.u32 %s1242_s20, 4  ;;  %s1029_s21 = int_to_ptr.vmem [resolvable:$true] %s1028_s21 }
   0xf   :  { %156 = vmatpush.bf16.msra.mxu2 %v1351_v31 }
  0x10   :  { %1040 = vmatmul.msk.bf16.vlgmr.msra.gmra.mxu1 %vm50_vm2, %v40_v29  ;;  %170 = vmatpush.bf16.msra.mxu3 %v1348_v30 }
  0x11   :  { %261 = vmatpush.bf16.msrb.mxu1 %v1292_v3  ;;  %248 = vmatpush.bf16.msrb.mxu0 %v1324_v17 }
  0x12   :  { %1039 = vmatmul.msk.bf16.vlgmr.msra.gmra.mxu0 %vm50_vm2, %v40_v29 }
  0x13   :  { %171 = vmatmul.bf16.vlgmr.msra.gmra.mxu3 %v1240_v35  ;;  %157 = vmatpush.bf16.msra.mxu2 %v1363_v34 }
  0x14   :  { %370 = vmatpush.bf16.msrb.mxu3 %v1292_v3 }
  0x15   :  { %262 = vmatpush.bf16.msrb.mxu1 %v1301_v6  ;;  %249 = vmatpush.bf16.msrb.mxu0 %v1342_v23 }
  0x16   :  { %158 = vmatmul.bf16.vlgmr.msra.gmra.mxu2 %v1240_v35 }
  0x17   :  { %357 = vmatpush.bf16.msrb.mxu2 %v1324_v17 }
  0x18   :  { %371 = vmatpush.bf16.msrb.mxu3 %v1301_v6 }
  0x19   :  { %263 = vmatpush.bf16.msrb.mxu1 %v1330_v19  ;;  %250 = vmatpush.bf16.msrb.mxu0 %v1351_v31 }
  0x1b   :  { %358 = vmatpush.bf16.msrb.mxu2 %v1342_v23 }
  0x1c   :  { %372 = vmatpush.bf16.msrb.mxu3 %v1330_v19 }
  0x1d   :  { %264 = vmatpush.bf16.msrb.mxu1 %v1348_v30  ;;  %251 = vmatpush.bf16.msrb.mxu0 %v1363_v34 }
  0x1f   :  { %359 = vmatpush.bf16.msrb.mxu2 %v1351_v31 }
  0x20   :  { %373 = vmatpush.bf16.msrb.mxu3 %v1348_v30 }
  0x21   :  { %479 = vmatpush.bf16.msra.mxu1 %v1292_v3  ;;  %466 = vmatpush.bf16.msra.mxu0 %v1324_v17 }
  0x23   :  { %360 = vmatpush.bf16.msrb.mxu2 %v1363_v34 }
  0x24   :  { %588 = vmatpush.bf16.msra.mxu3 %v1292_v3 }
  0x25   :  { %480 = vmatpush.bf16.msra.mxu1 %v1301_v6  ;;  %467 = vmatpush.bf16.msra.mxu0 %v1342_v23 }
  0x27   :  { %575 = vmatpush.bf16.msra.mxu2 %v1324_v17 }
  0x28   :  { %589 = vmatpush.bf16.msra.mxu3 %v1301_v6 }
  0x29   :  { %481 = vmatpush.bf16.msra.mxu1 %v1330_v19  ;;  %468 = vmatpush.bf16.msra.mxu0 %v1351_v31 }
  0x2b   :  { %576 = vmatpush.bf16.msra.mxu2 %v1342_v23 }
  0x2c   :  { %590 = vmatpush.bf16.msra.mxu3 %v1330_v19 }
  0x2d   :  { %482 = vmatpush.bf16.msra.mxu1 %v1348_v30  ;;  %469 = vmatpush.bf16.msra.mxu0 %v1363_v34 }
  0x2f   :  { %577 = vmatpush.bf16.msra.mxu2 %v1351_v31 }
  0x30   :  { %591 = vmatpush.bf16.msra.mxu3 %v1348_v30 }
  0x33   :  { %578 = vmatpush.bf16.msra.mxu2 %v1363_v34 }
  0x8d   :  { %v85_v38 = vpop.f32.mrf.mxu1 }
  0x8e   :  { %v1404_v39 = vadd.f32 %v85_v38, %v43_v37 }
  0x8f   :  { %v71_v47 = vpop.f32.mrf.mxu0 }
  0x90   :  { %v1411_v48 = vadd.f32 %v71_v47, %v42_v46 }
  0x95   :  { %v1435_v28 = vpop.f32.mrf.mxu1 }
  0x96   :  { %v172_v40 = vpop.f32.mrf.mxu3 }
  0x97   :  { %v177_v41 = vadd.f32 %v172_v40, %v1404_v39  ;;  %v1437_v29 = vpop.f32.mrf.mxu0 }
  0x99   :  { %1117 = vtanh.f32 %v177_v41  ;;  %v159_v42 = vpop.f32.mrf.mxu2  ;;  %v1074_v7 = vmul.f32 -1.442695, %v177_v41 }
  0x9a   :  { %v176_v49 = vadd.f32 %v159_v42, %v1411_v48 }
  0x9c   :  { %v1073_v50 = vmul.f32 -1.442695, %v176_v49 }
  0x9e   :  { %v174_v43 = vpop.f32.mrf.mxu3  ;;  %1119 = vpow2.f32 %v1073_v50 }
  0x9f   :  { %v1118_v44 = vpop.eup %1117 }
  0xa0   :  { %219 = vrot.lane.b32.xlu0 %v1118_v44, %s1241_s15 }
  0xa1   :  { %v161_v45 = vpop.f32.mrf.mxu2 }
  0xa4   :  { %v1120_v51 = vpop.eup %1119 }
  0xa5   :  { %v184_v52 = vadd.f32 1.0, %v1120_v51 }
  0xa7   :  { %1121 = vrcp.f32 %v184_v52  ;;  %vm191_vm3 = vweird.f32 %v184_v52  ;;  %v197_v57 = vand.u32 2147483648, %v184_v52  ;;  %v195_v59 = vand.u32 2147483647, %v184_v52 }
  0xa9   :  { %v198_v60 = vor.u32 1.1754944e-38, %v197_v57  ;;  %vm196_vm6 = vcmp.eq.f32.partialorder %v195_v59, 8.507059e+37 }
  0xad   :  { %v1122_v53 = vpop.eup %1121 }
  0xae   :  { %v187_v54 = vmul.f32 %v1122_v53, %v184_v52  ;;  %vm192_vm4 = vweird.f32 %v1122_v53 }
  0xaf   :  { %vm193_vm5 = vmor %vm191_vm3, %vm192_vm4 }
  0xb0   :  { %v188_v55 = vsub.f32 1.0, %v187_v54 }
  0xb2   :  { %v189_v56 = vmul.f32 %v1122_v53, %v188_v55 }
  0xb4   :  { %v190_v58 = vadd.f32 %v1122_v53, %v189_v56 }
  0xb6   :  { %v194_v61 = vsel %vm193_vm5, %v1122_v53, %v190_v58 }
  0xb7   :  { %v199_v63 = vsel %vm196_vm6, %v198_v60, %v194_v61 }
  0xb8   :  { %v217_v1 = vmul.f32 0.0, %v199_v63 }
 0x112   :  { %v220_v62 = vpop.permute.xlu0 %219 }
 0x113   :  { %v222_v0 = vmul.f32 %v220_v62, %v199_v63 }
 0x115   :  { %224 = vrot.lane.b32.xlu0 %v222_v0, %s1241_s15 }
 0x187   :  { %v225_v2 = vpop.permute.xlu0 %224 }
 0x188   :  { %v227_v4 = vadd.f32 %v225_v2, %v217_v1 }
 0x18a   :  { %1123 = vtanh.f32 %v227_v4 }
 0x18b   :  { %1125 = vpow2.f32 %v1074_v7 }
 0x190   :  { %v1124_v5 = vpop.eup %1123 }
 0x191   :  { %230 = vrot.lane.b32.xlu1 %v1124_v5, %s1241_s15  ;;  %v1126_v8 = vpop.eup %1125 }
 0x192   :  { %v185_v9 = vadd.f32 1.0, %v1126_v8 }
 0x194   :  { %1127 = vrcp.f32 %v185_v9  ;;  %v212_v15 = vand.u32 2147483648, %v185_v9  ;;  %vm206_vm8 = vweird.f32 %v185_v9  ;;  %v210_v16 = vand.u32 2147483647, %v185_v9 }
 0x196   :  { %v213_v21 = vor.u32 1.1754944e-38, %v212_v15  ;;  %vm211_vm10 = vcmp.eq.f32.partialorder %v210_v16, 8.507059e+37 }
 0x199   :  { %236 = vrot.lane.b32.xlu1 %v227_v4, %s1241_s15 }
 0x19a   :  { %v1128_v10 = vpop.eup %1127 }
 0x19b   :  { %v202_v11 = vmul.f32 %v1128_v10, %v185_v9  ;;  %vm207_vm7 = vweird.f32 %v1128_v10 }
 0x19c   :  { %vm208_vm9 = vmor %vm206_vm8, %vm207_vm7 }
 0x19d   :  { %v203_v12 = vsub.f32 1.0, %v202_v11  ;;  %v91_v11 = vld [vmem:[%s1634_s1 + $0x2] sm:$0x3] }
 0x19e   :  { %vm99_vm1 = vcmp.ne.f32.partialorder %v91_v11, 0.0 }
 0x19f   :  { %v204_v13 = vmul.f32 %v1128_v10, %v203_v12 }
 0x1a1   :  { %v205_v14 = vadd.f32 %v1128_v10, %v204_v13 }
 0x1a3   :  { %v209_v20 = vsel %vm208_vm9, %v1128_v10, %v205_v14 }
 0x1a4   :  { %v214_v22 = vsel %vm211_vm10, %v213_v21, %v209_v20 }
 0x203   :  { %v231_v24 = vpop.permute.xlu1 %230 }
 0x204   :  { %v233_v25 = vmul.f32 %v231_v24, %v214_v22 }
 0x206   :  { %v1421_v26 = vsel %vm98_vm11, %v233_v25, 0.0 }
 0x207   :  { %v240_v27 = vpack.c.bf16 %v1421_v26, %v1421_v26 }
 0x209   :  { %1075 = vmatmul.msk.bf16.vlgmr.msrb.gmra.mxu0 %vm146_vm12, %v240_v27  ;;  %1076 = vmatmul.msk.bf16.vlgmr.msrb.gmra.mxu1 %vm146_vm12, %v240_v27 }
 0x20a   :  { %686 = vmatpush.bf16.msrb.mxu1 %v1292_v3  ;;  %673 = vmatpush.bf16.msrb.mxu0 %v1324_v17 }
 0x20b   :  { %v237_v43 = vpop.permute.xlu1 %236 }
 0x20c   :  { %v239_v44 = vsel %vm98_vm11, %v237_v43, 0.0 }
 0x20d   :  { %v318_v45 = vrot.slane %v239_v44, 6 }
 0x20e   :  { %687 = vmatpush.bf16.msrb.mxu1 %v1301_v6  ;;  %674 = vmatpush.bf16.msrb.mxu0 %v1342_v23 }
 0x212   :  { %688 = vmatpush.bf16.msrb.mxu1 %v1330_v19  ;;  %675 = vmatpush.bf16.msrb.mxu0 %v1351_v31 }
 0x216   :  { %689 = vmatpush.bf16.msrb.mxu1 %v1348_v30  ;;  %676 = vmatpush.bf16.msrb.mxu0 %v1363_v34 }
 0x286   :  { %v253_v32 = vpop.f32.mrf.mxu0  ;;  %v266_v33 = vpop.f32.mrf.mxu1 }
 0x287   :  { %v273_v35 = vrot.slane %v266_v33, 6  ;;  %v272_v47 = vrot.slane %v253_v32, 6 }
 0x289   :  { %v277_v38 = vadd.f32 %v273_v35, %v1404_v39  ;;  %v276_v49 = vadd.f32 %v272_v47, %v1411_v48 }
 0x28b   :  { %1129 = vtanh.f32 %v277_v38  ;;  %v1077_v50 = vmul.f32 -1.442695, %v276_v49  ;;  %v1078_v9 = vmul.f32 -1.442695, %v277_v38 }
 0x28d   :  { %1131 = vpow2.f32 %v1077_v50 }
 0x28e   :  { %v255_v40 = vpop.f32.mrf.mxu0  ;;  %v268_v41 = vpop.f32.mrf.mxu1 }
 0x291   :  { %v1130_v42 = vpop.eup %1129 }
 0x292   :  { %324 = vrot.lane.b32.xlu2 %v1130_v42, %s1241_s15 }
 0x293   :  { %v1132_v51 = vpop.eup %1131 }
 0x294   :  { %v284_v52 = vadd.f32 1.0, %v1132_v51 }
 0x296   :  { %1133 = vrcp.f32 %v284_v52  ;;  %v297_v58 = vand.u32 2147483648, %v284_v52  ;;  %vm291_vm14 = vweird.f32 %v284_v52  ;;  %v295_v59 = vand.u32 2147483647, %v284_v52 }
 0x298   :  { %v298_v61 = vor.u32 1.1754944e-38, %v297_v58  ;;  %vm296_vm0 = vcmp.eq.f32.partialorder %v295_v59, 8.507059e+37 }
 0x29a   :  { %319 = vrot.lane.b32.xlu2 %v318_v45, %s1241_s15 }
 0x29c   :  { %v1134_v53 = vpop.eup %1133 }
 0x29d   :  { %v287_v54 = vmul.f32 %v1134_v53, %v284_v52  ;;  %vm292_vm13 = vweird.f32 %v1134_v53 }
 0x29e   :  { %vm293_vm15 = vmor %vm291_vm14, %vm292_vm13 }
 0x29f   :  { %v288_v55 = vsub.f32 1.0, %v287_v54 }
 0x2a1   :  { %v289_v56 = vmul.f32 %v1134_v53, %v288_v55 }
 0x2a3   :  { %v290_v57 = vadd.f32 %v1134_v53, %v289_v56 }
 0x2a5   :  { %v294_v60 = vsel %vm293_vm15, %v1134_v53, %v290_v57 }
 0x2a6   :  { %v299_v63 = vsel %vm296_vm0, %v298_v61, %v294_v60 }
 0x2ec   :  { %v325_v62 = vpop.permute.xlu2 %324 }
 0x2ed   :  { %v327_v0 = vmul.f32 %v325_v62, %v299_v63 }
 0x2ef   :  { %329 = vrot.lane.b32.xlu0 %v327_v0, %s1241_s15 }
 0x2f4   :  { %v320_v1 = vpop.permute.xlu2 %319 }
 0x2f5   :  { %v322_v2 = vmul.f32 %v320_v1, %v299_v63 }
 0x361   :  { %v330_v4 = vpop.permute.xlu0 %329 }
 0x362   :  { %v332_v5 = vadd.f32 %v330_v4, %v322_v2 }
 0x364   :  { %1135 = vtanh.f32 %v332_v5  ;;  %v344_v7 = vrot.slane %v332_v5, 2 }
 0x365   :  { %1137 = vpow2.f32 %v1078_v9 }
 0x366   :  { %345 = vrot.lane.b32.xlu2 %v344_v7, %s1241_s15 }
 0x36a   :  { %v1136_v8 = vpop.eup %1135 }
 0x36b   :  { %335 = vrot.lane.b32.xlu1 %v1136_v8, %s1241_s15  ;;  %v1138_v10 = vpop.eup %1137 }
 0x36c   :  { %v285_v12 = vadd.f32 1.0, %v1138_v10 }
 0x36e   :  { %1139 = vrcp.f32 %v285_v12  ;;  %v312_v24 = vand.u32 2147483648, %v285_v12  ;;  %vm306_vm3 = vweird.f32 %v285_v12  ;;  %v310_v25 = vand.u32 2147483647, %v285_v12 }
 0x370   :  { %v313_v32 = vor.u32 1.1754944e-38, %v312_v24  ;;  %vm311_vm5 = vcmp.eq.f32.partialorder %v310_v25, 8.507059e+37 }
 0x374   :  { %v1140_v16 = vpop.eup %1139 }
 0x375   :  { %v302_v18 = vmul.f32 %v1140_v16, %v285_v12  ;;  %vm307_vm2 = vweird.f32 %v1140_v16 }
 0x376   :  { %vm308_vm4 = vmor %vm306_vm3, %vm307_vm2 }
 0x377   :  { %v303_v20 = vsub.f32 1.0, %v302_v18 }
 0x379   :  { %v304_v21 = vmul.f32 %v1140_v16, %v303_v20 }
 0x37b   :  { %v305_v22 = vadd.f32 %v1140_v16, %v304_v21 }
 0x37d   :  { %v309_v27 = vsel %vm308_vm4, %v1140_v16, %v305_v22  ;;  %v92_v22 = vld [vmem:[%s1634_s1 + $0x4] sm:$0x3] }
 0x37e   :  { %v314_v33 = vsel %vm311_vm5, %v313_v32, %v309_v27  ;;  %vm100_vm10 = vcmp.ne.f32.partialorder %v92_v22, 0.0 }
 0x3c0   :  { %v346_v13 = vpop.permute.xlu2 %345 }
 0x3c1   :  { %v1451_v14 = vsel %vm99_vm1, %v346_v13, %v239_v44 }
 0x3c2   :  { %v427_v15 = vrot.slane %v1451_v14, 4 }
 0x3c4   :  { %428 = vrot.lane.b32.xlu1 %v427_v15, %s1241_s15 }
 0x3dd   :  { %v336_v35 = vpop.permute.xlu1 %335 }
 0x3de   :  { %v338_v38 = vmul.f32 %v336_v35, %v314_v33 }
 0x3e0   :  { %v340_v40 = vrot.slane %v338_v38, 2 }
 0x3e2   :  { %v1457_v41 = vsel %vm99_vm1, %v340_v40, %v1421_v26 }
 0x3e3   :  { %v349_v42 = vpack.c.bf16 %v1457_v41, %v1457_v41 }
 0x3e5   :  { %1079 = vmatmul.msk.bf16.vlgmr.msrb.gmra.mxu2 %vm146_vm12, %v349_v42  ;;  %1080 = vmatmul.msk.bf16.vlgmr.msrb.gmra.mxu3 %vm146_vm12, %v349_v42 }
 0x3e6   :  { %795 = vmatpush.bf16.msrb.mxu3 %v1292_v3  ;;  %782 = vmatpush.bf16.msrb.mxu2 %v1324_v17 }
 0x3ea   :  { %796 = vmatpush.bf16.msrb.mxu3 %v1301_v6  ;;  %783 = vmatpush.bf16.msrb.mxu2 %v1342_v23 }
 0x3ee   :  { %797 = vmatpush.bf16.msrb.mxu3 %v1330_v19  ;;  %784 = vmatpush.bf16.msrb.mxu2 %v1351_v31 }
 0x3f2   :  { %798 = vmatpush.bf16.msrb.mxu3 %v1348_v30  ;;  %785 = vmatpush.bf16.msrb.mxu2 %v1363_v34 }
 0x436   :  { %v429_v5 = vpop.permute.xlu1 %428 }
 0x468   :  { %v362_v26 = vpop.f32.mrf.mxu2  ;;  %v375_v43 = vpop.f32.mrf.mxu3 }
 0x469   :  { %v382_v44 = vrot.slane %v375_v43, 4  ;;  %v381_v51 = vrot.slane %v362_v26, 4 }
 0x46b   :  { %v386_v45 = vadd.f32 %v382_v44, %v1404_v39  ;;  %v385_v52 = vadd.f32 %v381_v51, %v1411_v48 }
 0x46d   :  { %1141 = vtanh.f32 %v386_v45  ;;  %v1081_v53 = vmul.f32 -1.442695, %v385_v52  ;;  %v1082_v12 = vmul.f32 -1.442695, %v386_v45 }
 0x46f   :  { %1143 = vpow2.f32 %v1081_v53 }
 0x470   :  { %v364_v47 = vpop.f32.mrf.mxu2  ;;  %v377_v49 = vpop.f32.mrf.mxu3 }
 0x473   :  { %v1142_v50 = vpop.eup %1141 }
 0x474   :  { %433 = vrot.lane.b32.xlu0 %v1142_v50, %s1241_s15 }
 0x475   :  { %v1144_v54 = vpop.eup %1143 }
 0x476   :  { %v393_v55 = vadd.f32 1.0, %v1144_v54 }
 0x478   :  { %1145 = vrcp.f32 %v393_v55  ;;  %v406_v61 = vand.u32 2147483648, %v393_v55  ;;  %vm400_vm7 = vweird.f32 %v393_v55  ;;  %v404_v62 = vand.u32 2147483647, %v393_v55 }
 0x47a   :  { %v407_v0 = vor.u32 1.1754944e-38, %v406_v61  ;;  %vm405_vm9 = vcmp.eq.f32.partialorder %v404_v62, 8.507059e+37 }
 0x47e   :  { %v1146_v56 = vpop.eup %1145 }
 0x47f   :  { %v396_v57 = vmul.f32 %v1146_v56, %v393_v55  ;;  %vm401_vm6 = vweird.f32 %v1146_v56 }
 0x480   :  { %vm402_vm8 = vmor %vm400_vm7, %vm401_vm6 }
 0x481   :  { %v397_v58 = vsub.f32 1.0, %v396_v57 }
 0x483   :  { %v398_v59 = vmul.f32 %v1146_v56, %v397_v58 }
 0x485   :  { %v399_v60 = vadd.f32 %v1146_v56, %v398_v59 }
 0x487   :  { %v403_v63 = vsel %vm402_vm8, %v1146_v56, %v399_v60 }
 0x488   :  { %v408_v2 = vsel %vm405_vm9, %v407_v0, %v403_v63 }
 0x489   :  { %v431_v7 = vmul.f32 %v429_v5, %v408_v2 }
 0x4e6   :  { %v434_v1 = vpop.permute.xlu0 %433 }
 0x4e7   :  { %v436_v4 = vmul.f32 %v434_v1, %v408_v2 }
 0x4e9   :  { %438 = vrot.lane.b32.xlu2 %v436_v4, %s1241_s15 }
 0x543   :  { %v439_v8 = vpop.permute.xlu2 %438 }
 0x544   :  { %v441_v9 = vadd.f32 %v439_v8, %v431_v7 }
 0x546   :  { %1147 = vtanh.f32 %v441_v9  ;;  %v453_v10 = vrot.slane %v441_v9, 4 }
 0x547   :  { %1149 = vpow2.f32 %v1082_v12 }
 0x548   :  { %454 = vrot.lane.b32.xlu1 %v453_v10, %s1241_s15 }
 0x54c   :  { %v1148_v11 = vpop.eup %1147 }
 0x54d   :  { %444 = vrot.lane.b32.xlu0 %v1148_v11, %s1241_s15  ;;  %v1150_v13 = vpop.eup %1149 }
 0x54e   :  { %v394_v15 = vadd.f32 1.0, %v1150_v13 }
 0x550   :  { %1151 = vrcp.f32 %v394_v15  ;;  %v421_v25 = vand.u32 2147483648, %v394_v15  ;;  %vm415_vm13 = vweird.f32 %v394_v15  ;;  %v419_v32 = vand.u32 2147483647, %v394_v15 }
 0x552   :  { %v422_v40 = vor.u32 1.1754944e-38, %v421_v25  ;;  %vm420_vm15 = vcmp.eq.f32.partialorder %v419_v32, 8.507059e+37 }
 0x556   :  { %v1152_v16 = vpop.eup %1151 }
 0x557   :  { %v411_v18 = vmul.f32 %v1152_v16, %v394_v15  ;;  %vm416_vm11 = vweird.f32 %v1152_v16 }
 0x558   :  { %vm417_vm14 = vmor %vm415_vm13, %vm416_vm11 }
 0x559   :  { %v412_v20 = vsub.f32 1.0, %v411_v18 }
 0x55b   :  { %v413_v21 = vmul.f32 %v1152_v16, %v412_v20  ;;  %v93_v20 = vld [vmem:[%s1634_s1 + $0x6] sm:$0x3] }
 0x55c   :  { %vm101_vm8 = vcmp.ne.f32.partialorder %v93_v20, 0.0 }
 0x55d   :  { %v414_v24 = vadd.f32 %v1152_v16, %v413_v21 }
 0x55f   :  { %v418_v38 = vsel %vm417_vm14, %v1152_v16, %v414_v24 }
 0x560   :  { %v423_v42 = vsel %vm420_vm15, %v422_v40, %v418_v38  ;;  %v1523_v40 = vadd.f32 %v1435_v28, %v43_v37 }
 0x5ba   :  { %v455_v27 = vpop.permute.xlu1 %454 }
 0x5bb   :  { %v1482_v33 = vsel %vm100_vm10, %v455_v27, %v1451_v14 }
 0x5bc   :  { %v536_v35 = vrot.slane %v1482_v33, 2 }
 0x5be   :  { %537 = vrot.lane.b32.xlu0 %v536_v35, %s1241_s15 }
 0x5bf   :  { %v445_v26 = vpop.permute.xlu0 %444 }
 0x5c0   :  { %v447_v43 = vmul.f32 %v445_v26, %v423_v42 }
 0x5c2   :  { %v449_v44 = vrot.slane %v447_v43, 4 }
 0x5c4   :  { %v1488_v45 = vsel %vm100_vm10, %v449_v44, %v1457_v41 }
 0x5c5   :  { %v458_v14 = vpack.c.bf16 %v1488_v45, %v1488_v45 }
 0x5c7   :  { %1083 = vmatmul.msk.bf16.vlgmr.msra.gmra.mxu0 %vm146_vm12, %v458_v14  ;;  %1084 = vmatmul.msk.bf16.vlgmr.msra.gmra.mxu1 %vm146_vm12, %v458_v14 }
 0x5c8   :  { %904 = vmatpush.bf16.msra.mxu1 %v1292_v3  ;;  %891 = vmatpush.bf16.msra.mxu0 %v1324_v17 }
 0x5cc   :  { %905 = vmatpush.bf16.msra.mxu1 %v1301_v6  ;;  %892 = vmatpush.bf16.msra.mxu0 %v1342_v23 }
 0x5d0   :  { %906 = vmatpush.bf16.msra.mxu1 %v1330_v19  ;;  %893 = vmatpush.bf16.msra.mxu0 %v1351_v31 }
 0x5d4   :  { %907 = vmatpush.bf16.msra.mxu1 %v1348_v30  ;;  %894 = vmatpush.bf16.msra.mxu0 %v1363_v34 }
 0x630   :  { %v538_v61 = vpop.permute.xlu0 %537 }
 0x644   :  { %v471_v41 = vpop.f32.mrf.mxu0  ;;  %v484_v47 = vpop.f32.mrf.mxu1 }
 0x645   :  { %v491_v49 = vrot.slane %v484_v47, 2  ;;  %v490_v6 = vrot.slane %v471_v41, 2 }
 0x647   :  { %v495_v50 = vadd.f32 %v491_v49, %v1404_v39  ;;  %v494_v19 = vadd.f32 %v490_v6, %v1411_v48 }
 0x649   :  { %1153 = vtanh.f32 %v495_v50  ;;  %v1085_v23 = vmul.f32 -1.442695, %v494_v19  ;;  %v1086_v4 = vmul.f32 -1.442695, %v495_v50 }
 0x64b   :  { %1155 = vpow2.f32 %v1085_v23 }
 0x64c   :  { %v473_v3 = vpop.f32.mrf.mxu0  ;;  %v486_v17 = vpop.f32.mrf.mxu1 }
 0x64f   :  { %v1154_v51 = vpop.eup %1153 }
 0x650   :  { %542 = vrot.lane.b32.xlu2 %v1154_v51, %s1241_s15 }
 0x651   :  { %v1156_v31 = vpop.eup %1155 }
 0x652   :  { %v502_v30 = vadd.f32 1.0, %v1156_v31 }
 0x654   :  { %1157 = vrcp.f32 %v502_v30  ;;  %v515_v39 = vand.u32 2147483648, %v502_v30  ;;  %vm509_vm1 = vweird.f32 %v502_v30  ;;  %v513_v56 = vand.u32 2147483647, %v502_v30 }
 0x656   :  { %v516_v58 = vor.u32 1.1754944e-38, %v515_v39  ;;  %vm514_vm3 = vcmp.eq.f32.partialorder %v513_v56, 8.507059e+37  ;;  %v94_v39 = vld [vmem:[%s1634_s1 + $0x8] sm:$0x3] }
 0x657   :  { %vm102_vm14 = vcmp.ne.f32.partialorder %v94_v39, 0.0 }
 0x65a   :  { %v1158_v34 = vpop.eup %1157 }
 0x65b   :  { %v505_v52 = vmul.f32 %v1158_v34, %v502_v30  ;;  %vm510_vm0 = vweird.f32 %v1158_v34 }
 0x65c   :  { %vm511_vm2 = vmor %vm509_vm1, %vm510_vm0 }
 0x65d   :  { %v506_v53 = vsub.f32 1.0, %v505_v52 }
 0x65f   :  { %v507_v54 = vmul.f32 %v1158_v34, %v506_v53 }
 0x661   :  { %v508_v55 = vadd.f32 %v1158_v34, %v507_v54 }
 0x663   :  { %v512_v57 = vsel %vm511_vm2, %v1158_v34, %v508_v55 }
 0x664   :  { %v517_v48 = vsel %vm514_vm3, %v516_v58, %v512_v57 }
 0x665   :  { %v540_v62 = vmul.f32 %v538_v61, %v517_v48 }
 0x6aa   :  { %v543_v59 = vpop.permute.xlu2 %542 }
 0x6ab   :  { %v545_v60 = vmul.f32 %v543_v59, %v517_v48 }
 0x6ad   :  { %547 = vrot.lane.b32.xlu1 %v545_v60, %s1241_s15 }
 0x71f   :  { %v548_v63 = vpop.permute.xlu1 %547 }
 0x720   :  { %v550_v0 = vadd.f32 %v548_v63, %v540_v62 }
 0x722   :  { %1159 = vtanh.f32 %v550_v0  ;;  %v562_v1 = vrot.slane %v550_v0, 6 }
 0x723   :  { %1161 = vpow2.f32 %v1086_v4 }
 0x724   :  { %563 = vrot.lane.b32.xlu0 %v562_v1, %s1241_s15 }
 0x728   :  { %v1160_v2 = vpop.eup %1159 }
 0x729   :  { %553 = vrot.lane.b32.xlu2 %v1160_v2, %s1241_s15  ;;  %v1162_v5 = vpop.eup %1161 }
 0x72a   :  { %v503_v7 = vadd.f32 1.0, %v1162_v5 }
 0x72c   :  { %1163 = vrcp.f32 %v503_v7  ;;  %v530_v13 = vand.u32 2147483648, %v503_v7  ;;  %vm524_vm5 = vweird.f32 %v503_v7  ;;  %v528_v15 = vand.u32 2147483647, %v503_v7 }
 0x72e   :  { %v531_v18 = vor.u32 1.1754944e-38, %v530_v13  ;;  %vm529_vm7 = vcmp.eq.f32.partialorder %v528_v15, 8.507059e+37 }
 0x732   :  { %v1164_v8 = vpop.eup %1163 }
 0x733   :  { %v520_v9 = vmul.f32 %v1164_v8, %v503_v7  ;;  %vm525_vm4 = vweird.f32 %v1164_v8 }
 0x734   :  { %vm526_vm6 = vmor %vm524_vm5, %vm525_vm4 }
 0x735   :  { %v521_v10 = vsub.f32 1.0, %v520_v9 }
 0x737   :  { %v522_v11 = vmul.f32 %v1164_v8, %v521_v10 }
 0x739   :  { %v523_v12 = vadd.f32 %v1164_v8, %v522_v11 }
 0x73b   :  { %v527_v16 = vsel %vm526_vm6, %v1164_v8, %v523_v12 }
 0x73c   :  { %v532_v21 = vsel %vm529_vm7, %v531_v18, %v527_v16 }
 0x783   :  { %v554_v22 = vpop.permute.xlu2 %553 }
 0x784   :  { %v556_v24 = vmul.f32 %v554_v22, %v532_v21 }
 0x786   :  { %v558_v25 = vrot.slane %v556_v24, 6 }
 0x788   :  { %v1512_v27 = vsel %vm101_vm8, %v558_v25, %v1488_v45 }
 0x789   :  { %v567_v32 = vpack.c.bf16 %v1512_v27, %v1512_v27 }
 0x78b   :  { %1087 = vmatmul.msk.bf16.vlgmr.msra.gmra.mxu2 %vm146_vm12, %v567_v32  ;;  %1088 = vmatmul.msk.bf16.vlgmr.msra.gmra.mxu3 %vm146_vm12, %v567_v32 }
 0x796   :  { %v564_v35 = vpop.permute.xlu0 %563 }
 0x797   :  { %v566_v38 = vsel %vm101_vm8, %v564_v35, %v1482_v33  ;;  %v1530_v33 = vadd.f32 %v1437_v29, %v42_v46 }
 0x798   :  { %639 = vrot.lane.b32.xlu2 %v566_v38, %s1241_s15 }
 0x7f2   :  { %v640_v30 = vpop.permute.xlu2 %639 }
 0x80e   :  { %v580_v42 = vpop.f32.mrf.mxu2  ;;  %v593_v26 = vpop.f32.mrf.mxu3 }
 0x80f   :  { %v598_v43 = vadd.f32 %v593_v26, %v1523_v40  ;;  %v597_v41 = vadd.f32 %v580_v42, %v1530_v33 }
 0x811   :  { %1165 = vtanh.f32 %v598_v43  ;;  %v1089_v47 = vmul.f32 -1.442695, %v597_v41  ;;  %v1090_v55 = vmul.f32 -1.442695, %v598_v43 }
 0x813   :  { %1167 = vpow2.f32 %v1089_v47 }
 0x816   :  { %v582_v44 = vpop.f32.mrf.mxu2  ;;  %v595_v45 = vpop.f32.mrf.mxu3 }
 0x817   :  { %v1166_v14 = vpop.eup %1165 }
 0x818   :  { %644 = vrot.lane.b32.xlu1 %v1166_v14, %s1241_s15 }
 0x819   :  { %v1168_v37 = vpop.eup %1167 }
 0x81a   :  { %v605_v28 = vadd.f32 1.0, %v1168_v37 }
 0x81c   :  { %1169 = vrcp.f32 %v605_v28  ;;  %v618_v6 = vand.u32 2147483648, %v605_v28  ;;  %vm612_vm10 = vweird.f32 %v605_v28  ;;  %v616_v19 = vand.u32 2147483647, %v605_v28 }
 0x81e   :  { %v619_v46 = vor.u32 1.1754944e-38, %v618_v6  ;;  %vm617_vm13 = vcmp.eq.f32.partialorder %v616_v19, 8.507059e+37 }
 0x822   :  { %v1170_v49 = vpop.eup %1169 }
 0x823   :  { %v608_v50 = vmul.f32 %v1170_v49, %v605_v28  ;;  %vm613_vm9 = vweird.f32 %v1170_v49 }
 0x824   :  { %vm614_vm11 = vmor %vm612_vm10, %vm613_vm9 }
 0x825   :  { %v609_v3 = vsub.f32 1.0, %v608_v50 }
 0x827   :  { %v610_v17 = vmul.f32 %v1170_v49, %v609_v3 }
 0x829   :  { %v611_v51 = vadd.f32 %v1170_v49, %v610_v17 }
 0x82b   :  { %v615_v36 = vsel %vm614_vm11, %v1170_v49, %v611_v51 }
 0x82c   :  { %v620_v23 = vsel %vm617_vm13, %v619_v46, %v615_v36 }
 0x82d   :  { %v642_v34 = vmul.f32 %v640_v30, %v620_v23 }
 0x88a   :  { %v645_v29 = vpop.permute.xlu1 %644 }
 0x88b   :  { %v647_v31 = vmul.f32 %v645_v29, %v620_v23 }
 0x88d   :  { %649 = vrot.lane.b32.xlu0 %v647_v31, %s1241_s15 }
 0x8ff   :  { %v650_v52 = vpop.permute.xlu0 %649 }
 0x900   :  { %v652_v53 = vadd.f32 %v650_v52, %v642_v34  ;;  %v95_v34 = vld [vmem:[%s1634_s1 + $0xa] sm:$0x3] }
 0x901   :  { %vm103_vm7 = vcmp.ne.f32.partialorder %v95_v34, 0.0 }
 0x902   :  { %1171 = vtanh.f32 %v652_v53  ;;  %661 = vrot.lane.b32.xlu2 %v652_v53, %s1241_s15 }
 0x903   :  { %1173 = vpow2.f32 %v1090_v55 }
 0x908   :  { %v1172_v54 = vpop.eup %1171 }
 0x909   :  { %655 = vrot.lane.b32.xlu1 %v1172_v54, %s1241_s15  ;;  %v1174_v56 = vpop.eup %1173 }
 0x90a   :  { %v606_v57 = vadd.f32 1.0, %v1174_v56 }
 0x90c   :  { %1175 = vrcp.f32 %v606_v57  ;;  %v633_v1 = vand.u32 2147483648, %v606_v57  ;;  %vm627_vm0 = vweird.f32 %v606_v57  ;;  %v631_v2 = vand.u32 2147483647, %v606_v57 }
 0x90e   :  { %v634_v5 = vor.u32 1.1754944e-38, %v633_v1  ;;  %vm632_vm2 = vcmp.eq.f32.partialorder %v631_v2, 8.507059e+37 }
 0x912   :  { %v1176_v60 = vpop.eup %1175 }
 0x913   :  { %v623_v61 = vmul.f32 %v1176_v60, %v606_v57  ;;  %vm628_vm15 = vweird.f32 %v1176_v60 }
 0x914   :  { %vm629_vm1 = vmor %vm627_vm0, %vm628_vm15 }
 0x915   :  { %v624_v62 = vsub.f32 1.0, %v623_v61 }
 0x917   :  { %v625_v63 = vmul.f32 %v1176_v60, %v624_v62 }
 0x919   :  { %v626_v0 = vadd.f32 %v1176_v60, %v625_v63 }
 0x91b   :  { %v630_v4 = vsel %vm629_vm1, %v1176_v60, %v626_v0 }
 0x91c   :  { %v635_v7 = vsel %vm632_vm2, %v634_v5, %v630_v4 }
 0x95c   :  { %v662_v58 = vpop.permute.xlu2 %661 }
 0x95d   :  { %v1540_v59 = vsel %vm102_vm14, %v662_v58, %v566_v38 }
 0x95e   :  { %v743_v48 = vrot.slane %v1540_v59, 6 }
 0x960   :  { %744 = vrot.lane.b32.xlu1 %v743_v48, %s1241_s15 }
 0x97b   :  { %v656_v8 = vpop.permute.xlu1 %655 }
 0x97c   :  { %v658_v9 = vmul.f32 %v656_v8, %v635_v7 }
 0x97e   :  { %v1546_v10 = vsel %vm102_vm14, %v658_v9, %v1512_v27 }
 0x97f   :  { %v665_v11 = vpack.c.bf16 %v1546_v10, %v1546_v10 }
 0x981   :  { %1091 = vmatmul.msk.bf16.vlgmr.msrb.gmra.mxu0 %vm146_vm12, %v665_v11  ;;  %1092 = vmatmul.msk.bf16.vlgmr.msrb.gmra.mxu1 %vm146_vm12, %v665_v11 }
 0x9d2   :  { %v745_v49 = vpop.permute.xlu1 %744 }
 0x9fe   :  { %v678_v12 = vpop.f32.mrf.mxu0  ;;  %v691_v13 = vpop.f32.mrf.mxu1 }
 0x9ff   :  { %v698_v15 = vrot.slane %v691_v13, 6  ;;  %v697_v22 = vrot.slane %v678_v12, 6 }
 0xa01   :  { %v702_v16 = vadd.f32 %v698_v15, %v1523_v40  ;;  %v701_v24 = vadd.f32 %v697_v22, %v1530_v33 }
 0xa03   :  { %1177 = vtanh.f32 %v702_v16  ;;  %v1093_v25 = vmul.f32 -1.442695, %v701_v24  ;;  %v1094_v19 = vmul.f32 -1.442695, %v702_v16 }
 0xa05   :  { %1179 = vpow2.f32 %v1093_v25 }
 0xa06   :  { %v680_v18 = vpop.f32.mrf.mxu0  ;;  %v693_v20 = vpop.f32.mrf.mxu1 }
 0xa09   :  { %v1178_v21 = vpop.eup %1177 }
 0xa0a   :  { %749 = vrot.lane.b32.xlu0 %v1178_v21, %s1241_s15 }
 0xa0b   :  { %v1180_v27 = vpop.eup %1179 }
 0xa0c   :  { %v709_v32 = vadd.f32 1.0, %v1180_v27 }
 0xa0e   :  { %1181 = vrcp.f32 %v709_v32  ;;  %v722_v44 = vand.u32 2147483648, %v709_v32  ;;  %vm716_vm4 = vweird.f32 %v709_v32  ;;  %v720_v45 = vand.u32 2147483647, %v709_v32 }
 0xa10   :  { %v723_v41 = vor.u32 1.1754944e-38, %v722_v44  ;;  %vm721_vm6 = vcmp.eq.f32.partialorder %v720_v45, 8.507059e+37 }
 0xa14   :  { %v1182_v35 = vpop.eup %1181 }
 0xa15   :  { %v712_v38 = vmul.f32 %v1182_v35, %v709_v32  ;;  %vm717_vm3 = vweird.f32 %v1182_v35 }
 0xa16   :  { %vm718_vm5 = vmor %vm716_vm4, %vm717_vm3 }
 0xa17   :  { %v713_v42 = vsub.f32 1.0, %v712_v38 }
 0xa19   :  { %v714_v26 = vmul.f32 %v1182_v35, %v713_v42 }
 0xa1b   :  { %v715_v43 = vadd.f32 %v1182_v35, %v714_v26 }
 0xa1d   :  { %v719_v14 = vsel %vm718_vm5, %v1182_v35, %v715_v43 }
 0xa1e   :  { %v724_v37 = vsel %vm721_vm6, %v723_v41, %v719_v14 }
 0xa1f   :  { %v747_v50 = vmul.f32 %v745_v49, %v724_v37 }
 0xa7c   :  { %v750_v47 = vpop.permute.xlu0 %749 }
 0xa7d   :  { %v752_v28 = vmul.f32 %v750_v47, %v724_v37 }
 0xa7f   :  { %754 = vrot.lane.b32.xlu2 %v752_v28, %s1241_s15 }
 0xad9   :  { %v755_v3 = vpop.permute.xlu2 %754 }
 0xada   :  { %v757_v17 = vadd.f32 %v755_v3, %v747_v50 }
 0xadc   :  { %1183 = vtanh.f32 %v757_v17  ;;  %v769_v51 = vrot.slane %v757_v17, 2 }
 0xadd   :  { %1185 = vpow2.f32 %v1094_v19 }
 0xade   :  { %770 = vrot.lane.b32.xlu1 %v769_v51, %s1241_s15 }
 0xae2   :  { %v1184_v6 = vpop.eup %1183 }
 0xae3   :  { %760 = vrot.lane.b32.xlu0 %v1184_v6, %s1241_s15  ;;  %v1186_v36 = vpop.eup %1185 }
 0xae4   :  { %v710_v46 = vadd.f32 1.0, %v1186_v36 }
 0xae6   :  { %1187 = vrcp.f32 %v710_v46  ;;  %v737_v53 = vand.u32 2147483648, %v710_v46  ;;  %vm731_vm9 = vweird.f32 %v710_v46  ;;  %v735_v55 = vand.u32 2147483647, %v710_v46 }
 0xae8   :  { %v738_v58 = vor.u32 1.1754944e-38, %v737_v53  ;;  %vm736_vm11 = vcmp.eq.f32.partialorder %v735_v55, 8.507059e+37 }
 0xaec   :  { %v1188_v29 = vpop.eup %1187 }
 0xaed   :  { %v727_v23 = vmul.f32 %v1188_v29, %v710_v46  ;;  %vm732_vm8 = vweird.f32 %v1188_v29  ;;  %v96_v46 = vld [vmem:[%s1634_s1 + $0xc] sm:$0x3] }
 0xaee   :  { %vm733_vm10 = vmor %vm731_vm9, %vm732_vm8  ;;  %vm104_vm5 = vcmp.ne.f32.partialorder %v96_v46, 0.0 }
 0xaef   :  { %v728_v31 = vsub.f32 1.0, %v727_v23 }
 0xaf1   :  { %v729_v30 = vmul.f32 %v1188_v29, %v728_v31 }
 0xaf3   :  { %v730_v52 = vadd.f32 %v1188_v29, %v729_v30 }
 0xaf5   :  { %v734_v57 = vsel %vm733_vm10, %v1188_v29, %v730_v52 }
 0xaf6   :  { %v739_v48 = vsel %vm736_vm11, %v738_v58, %v734_v57 }
 0xb50   :  { %v771_v54 = vpop.permute.xlu1 %770 }
 0xb51   :  { %v1563_v39 = vsel %vm103_vm7, %v771_v54, %v1540_v59 }
 0xb52   :  { %v852_v56 = vrot.slane %v1563_v39, 4 }
 0xb54   :  { %853 = vrot.lane.b32.xlu0 %v852_v56, %s1241_s15 }
 0xb55   :  { %v761_v60 = vpop.permute.xlu0 %760 }
 0xb56   :  { %v763_v61 = vmul.f32 %v761_v60, %v739_v48 }
 0xb58   :  { %v765_v62 = vrot.slane %v763_v61, 2 }
 0xb5a   :  { %v1569_v63 = vsel %vm103_vm7, %v765_v62, %v1546_v10 }
 0xb5b   :  { %v774_v59 = vpack.c.bf16 %v1569_v63, %v1569_v63 }
 0xb5d   :  { %1095 = vmatmul.msk.bf16.vlgmr.msrb.gmra.mxu2 %vm146_vm12, %v774_v59  ;;  %1096 = vmatmul.msk.bf16.vlgmr.msrb.gmra.mxu3 %vm146_vm12, %v774_v59 }
 0xbc6   :  { %v854_v42 = vpop.permute.xlu0 %853 }
 0xbe0   :  { %v787_v0 = vpop.f32.mrf.mxu2  ;;  %v800_v1 = vpop.f32.mrf.mxu3 }
 0xbe1   :  { %v807_v2 = vrot.slane %v800_v1, 4  ;;  %v806_v9 = vrot.slane %v787_v0, 4 }
 0xbe3   :  { %v811_v4 = vadd.f32 %v807_v2, %v1523_v40  ;;  %v810_v10 = vadd.f32 %v806_v9, %v1530_v33 }
 0xbe5   :  { %1189 = vtanh.f32 %v811_v4  ;;  %v1097_v11 = vmul.f32 -1.442695, %v810_v10  ;;  %v1098_v41 = vmul.f32 -1.442695, %v811_v4 }
 0xbe7   :  { %1191 = vpow2.f32 %v1097_v11 }
 0xbe8   :  { %v789_v5 = vpop.f32.mrf.mxu2  ;;  %v802_v7 = vpop.f32.mrf.mxu3 }
 0xbeb   :  { %v1190_v8 = vpop.eup %1189 }
 0xbec   :  { %858 = vrot.lane.b32.xlu2 %v1190_v8, %s1241_s15 }
 0xbed   :  { %v1192_v12 = vpop.eup %1191 }
 0xbee   :  { %v818_v13 = vadd.f32 1.0, %v1192_v12 }
 0xbf0   :  { %1193 = vrcp.f32 %v818_v13  ;;  %v831_v22 = vand.u32 2147483648, %v818_v13  ;;  %vm825_vm14 = vweird.f32 %v818_v13  ;;  %v829_v24 = vand.u32 2147483647, %v818_v13 }
 0xbf2   :  { %v832_v27 = vor.u32 1.1754944e-38, %v831_v22  ;;  %vm830_vm0 = vcmp.eq.f32.partialorder %v829_v24, 8.507059e+37  ;;  %v988_v22 = vld [vmem:[%s1638_s5 + $0x10] sm:$0xff] }
 0xbf6   :  { %v1194_v15 = vpop.eup %1193 }
 0xbf7   :  { %v821_v16 = vmul.f32 %v1194_v15, %v818_v13  ;;  %vm826_vm13 = vweird.f32 %v1194_v15 }
 0xbf8   :  { %vm827_vm15 = vmor %vm825_vm14, %vm826_vm13 }
 0xbf9   :  { %v822_v18 = vsub.f32 1.0, %v821_v16  ;;  %v992_v16 = vld [vmem:[%s1638_s5 + $0x30] sm:$0xff] }
 0xbfb   :  { %v823_v20 = vmul.f32 %v1194_v15, %v822_v18  ;;  %v991_v18 = vld [vmem:[%s1638_s5 + $0x28] sm:$0xff] }
 0xbfd   :  { %v824_v21 = vadd.f32 %v1194_v15, %v823_v20  ;;  %v990_v20 = vld [vmem:[%s1638_s5 + $0x20] sm:$0xff] }
 0xbff   :  { %v828_v25 = vsel %vm827_vm15, %v1194_v15, %v824_v21  ;;  %v993_v15 = vld [vmem:[%s1638_s5 + $0x38] sm:$0xff] }
 0xc00   :  { %v833_v35 = vsel %vm830_vm0, %v832_v27, %v828_v25  ;;  %1009 = vmatpush.msra.mxu2 %v993_v15  ;;  %v989_v21 = vld [vmem:[%s1638_s5 + $0x18] sm:$0xff]  ;;  %vm1021_vm0 = vcmask 9216  }
 0xc01   :  { %v856_v26 = vmul.f32 %v854_v42, %v833_v35 }
 0xc02   :  { %1010 = vmatpush.msra.mxu2 %v992_v16 }
 0xc04   :  { %1011 = vmatpush.msra.mxu2 %v991_v18 }
 0xc06   :  { %1012 = vmatpush.msra.mxu2 %v990_v20 }
 0xc08   :  { %1013 = vmatpush.msra.mxu2 %v989_v21 }
 0xc0a   :  { %1014 = vmatpush.msra.mxu2 %v988_v22 }
 0xc46   :  { %v859_v32 = vpop.permute.xlu2 %858 }
 0xc47   :  { %v861_v38 = vmul.f32 %v859_v32, %v833_v35 }
 0xc49   :  { %863 = vrot.lane.b32.xlu1 %v861_v38, %s1241_s15 }
 0xcbb   :  { %v864_v43 = vpop.permute.xlu1 %863 }
 0xcbc   :  { %v866_v44 = vadd.f32 %v864_v43, %v856_v26  ;;  %v987_v43 = vld [vmem:[%s1638_s5 + $0x8] sm:$0xff] }
 0xcbd   :  { %1015 = vmatpush.msra.mxu2 %v987_v43 }
 0xcbe   :  { %1195 = vtanh.f32 %v866_v44  ;;  %v878_v45 = vrot.slane %v866_v44, 4  ;;  %v986_v44 = vld [vmem:[%s1638_s5] sm:$0xff] }
 0xcbf   :  { %1197 = vpow2.f32 %v1098_v41  ;;  %1016 = vmatpush.msra.mxu2 %v986_v44 }
 0xcc0   :  { %879 = vrot.lane.b32.xlu0 %v878_v45, %s1241_s15 }
 0xcc4   :  { %v1196_v14 = vpop.eup %1195 }
 0xcc5   :  { %869 = vrot.lane.b32.xlu2 %v1196_v14, %s1241_s15  ;;  %v1198_v47 = vpop.eup %1197 }
 0xcc6   :  { %v819_v37 = vadd.f32 1.0, %v1198_v47 }
 0xcc8   :  { %1199 = vrcp.f32 %v819_v37  ;;  %v846_v51 = vand.u32 2147483648, %v819_v37  ;;  %vm840_vm2 = vweird.f32 %v819_v37  ;;  %v844_v6 = vand.u32 2147483647, %v819_v37 }
 0xcca   :  { %v847_v36 = vor.u32 1.1754944e-38, %v846_v51  ;;  %vm845_vm4 = vcmp.eq.f32.partialorder %v844_v6, 8.507059e+37 }
 0xcce   :  { %v1200_v28 = vpop.eup %1199 }
 0xccf   :  { %v836_v49 = vmul.f32 %v1200_v28, %v819_v37  ;;  %vm841_vm1 = vweird.f32 %v1200_v28 }
 0xcd0   :  { %vm842_vm3 = vmor %vm840_vm2, %vm841_vm1 }
 0xcd1   :  { %v837_v50 = vsub.f32 1.0, %v836_v49 }
 0xcd3   :  { %v838_v3 = vmul.f32 %v1200_v28, %v837_v50 }
 0xcd5   :  { %v839_v17 = vadd.f32 %v1200_v28, %v838_v3 }
 0xcd7   :  { %v843_v19 = vsel %vm842_vm3, %v1200_v28, %v839_v17  ;;  %v97_v17 = vld [vmem:[%s1634_s1 + $0xe] sm:$0x3]  ;;  %s1030_s1 = sshll.u32 %s1640_s7, 4  ;;  %s1031_s1 = int_to_ptr.hbm [resolvable:$true] %s1030_s1 }
 0xcd8   :  { %v848_v29 = vsel %vm845_vm4, %v847_v36, %v843_v19  ;;  %vm105_vm15 = vcmp.ne.f32.partialorder %v97_v17, 0.0 }
 0xd1f   :  { %v870_v23 = vpop.permute.xlu2 %869 }
 0xd20   :  { %v872_v31 = vmul.f32 %v870_v23, %v848_v29  ;;  %v1116_v29 = vld [vmem:[%s1639_s6] ss:$0 sm:$0xff] }
 0xd22   :  { %v874_v30 = vrot.slane %v872_v31, 4 }
 0xd24   :  { %v1585_v34 = vsel %vm104_vm5, %v874_v30, %v1569_v63 }
 0xd25   :  { %v883_v52 = vpack.c.bf16 %v1585_v34, %v1585_v34 }
 0xd27   :  { %1099 = vmatmul.msk.bf16.vlgmr.msra.gmra.mxu0 %vm146_vm12, %v883_v52  ;;  %1100 = vmatmul.msk.bf16.vlgmr.msra.gmra.mxu1 %vm146_vm12, %v883_v52 }
 0xd32   :  { %v880_v53 = vpop.permute.xlu0 %879 }
 0xd33   :  { %v882_v54 = vsel %vm104_vm5, %v880_v53, %v1563_v39 }
 0xd34   :  { %v961_v55 = vrot.slane %v882_v54, 2 }
 0xd36   :  { %962 = vrot.lane.b32.xlu2 %v961_v55, %s1241_s15 }
 0xd90   :  { %v963_v24 = vpop.permute.xlu2 %962 }
 0xda4   :  { %v896_v56 = vpop.f32.mrf.mxu0  ;;  %v909_v57 = vpop.f32.mrf.mxu1 }
 0xda5   :  { %v916_v58 = vrot.slane %v909_v57, 2  ;;  %v915_v63 = vrot.slane %v896_v56, 2 }
 0xda7   :  { %v920_v48 = vadd.f32 %v916_v58, %v1523_v40  ;;  %v919_v59 = vadd.f32 %v915_v63, %v1530_v33 }
 0xda9   :  { %1201 = vtanh.f32 %v920_v48  ;;  %v1101_v0 = vmul.f32 -1.442695, %v919_v59  ;;  %v1102_v38 = vmul.f32 -1.442695, %v920_v48 }
 0xdab   :  { %1203 = vpow2.f32 %v1101_v0 }
 0xdac   :  { %v898_v60 = vpop.f32.mrf.mxu0  ;;  %v911_v61 = vpop.f32.mrf.mxu1 }
 0xdaf   :  { %v1202_v62 = vpop.eup %1201 }
 0xdb0   :  { %967 = vrot.lane.b32.xlu1 %v1202_v62, %s1241_s15 }
 0xdb1   :  { %v1204_v39 = vpop.eup %1203 }
 0xdb2   :  { %v927_v1 = vadd.f32 1.0, %v1204_v39 }
 0xdb4   :  { %1205 = vrcp.f32 %v927_v1  ;;  %v940_v40 = vand.u32 2147483648, %v927_v1  ;;  %vm934_vm7 = vweird.f32 %v927_v1  ;;  %v938_v9 = vand.u32 2147483647, %v927_v1 }
 0xdb6   :  { %v941_v11 = vor.u32 1.1754944e-38, %v940_v40  ;;  %vm939_vm9 = vcmp.eq.f32.partialorder %v938_v9, 8.507059e+37 }
 0xdba   :  { %v1206_v2 = vpop.eup %1205 }
 0xdbb   :  { %v930_v4 = vmul.f32 %v1206_v2, %v927_v1  ;;  %vm935_vm6 = vweird.f32 %v1206_v2 }
 0xdbc   :  { %vm936_vm8 = vmor %vm934_vm7, %vm935_vm6 }
 0xdbd   :  { %v931_v5 = vsub.f32 1.0, %v930_v4 }
 0xdbf   :  { %v932_v7 = vmul.f32 %v1206_v2, %v931_v5 }
 0xdc1   :  { %v933_v8 = vadd.f32 %v1206_v2, %v932_v7 }
 0xdc3   :  { %v937_v10 = vsel %vm936_vm8, %v1206_v2, %v933_v8 }
 0xdc4   :  { %v942_v33 = vsel %vm939_vm9, %v941_v11, %v937_v10 }
 0xdc5   :  { %v965_v25 = vmul.f32 %v963_v24, %v942_v33 }
 0xe22   :  { %v968_v12 = vpop.permute.xlu1 %967 }
 0xe23   :  { %v970_v13 = vmul.f32 %v968_v12, %v942_v33 }
 0xe25   :  { %972 = vrot.lane.b32.xlu0 %v970_v13, %s1241_s15 }
 0xe97   :  { %v973_v27 = vpop.permute.xlu0 %972 }
 0xe98   :  { %v975_v32 = vadd.f32 %v973_v27, %v965_v25 }
 0xe9a   :  { %1207 = vtanh.f32 %v975_v32 }
 0xe9b   :  { %1209 = vpow2.f32 %v1102_v38 }
 0xea0   :  { %v1208_v35 = vpop.eup %1207 }
 0xea1   :  { %978 = vrot.lane.b32.xlu1 %v1208_v35, %s1241_s15  ;;  %v1210_v42 = vpop.eup %1209 }
 0xea2   :  { %v928_v26 = vadd.f32 1.0, %v1210_v42 }
 0xea4   :  { %1211 = vrcp.f32 %v928_v26  ;;  %v955_v28 = vand.u32 2147483648, %v928_v26  ;;  %vm949_vm11 = vweird.f32 %v928_v26  ;;  %v953_v49 = vand.u32 2147483647, %v928_v26 }
 0xea6   :  { %v956_v3 = vor.u32 1.1754944e-38, %v955_v28  ;;  %vm954_vm14 = vcmp.eq.f32.partialorder %v953_v49, 8.507059e+37 }
 0xeaa   :  { %v1212_v45 = vpop.eup %1211 }
 0xeab   :  { %v945_v14 = vmul.f32 %v1212_v45, %v928_v26  ;;  %vm950_vm10 = vweird.f32 %v1212_v45 }
 0xeac   :  { %vm951_vm13 = vmor %vm949_vm11, %vm950_vm10 }
 0xead   :  { %v946_v41 = vsub.f32 1.0, %v945_v14 }
 0xeaf   :  { %v947_v47 = vmul.f32 %v1212_v45, %v946_v41 }
 0xeb1   :  { %v948_v37 = vadd.f32 %v1212_v45, %v947_v47 }
 0xeb3   :  { %v952_v50 = vsel %vm951_vm13, %v1212_v45, %v948_v37 }
 0xeb4   :  { %v957_v51 = vsel %vm954_vm14, %v956_v3, %v952_v50 }
 0xf13   :  { %v979_v6 = vpop.permute.xlu1 %978 }
 0xf14   :  { %v981_v19 = vmul.f32 %v979_v6, %v957_v51 }
 0xf16   :  { %v983_v36 = vrot.slane %v981_v19, 6 }
 0xf18   :  { %v985_v46 = vsel %vm105_vm15, %v983_v36, %v1585_v34 }
 0xf19   :  { %1103 = vmatmul.msk.f32.vlgmr.msra.gmra.mxu2 %vm146_vm12, %v985_v46 }
 0xf9c   :  { %v1018_v23 = vpop.f32.mrf.mxu2 }
 0xf9d   :  { %v1019_v31 = vadd.f32 %v1116_v29, %v1018_v23 }
 0xf9f   :  { %1022 = vst.msk [vmem:[#allocation2] sm:$0x3] %vm1021_vm0, %v1019_v31 }
 0xfa0   :  { %1033 = dma.vmem_to_hbm [thread:$0]  %s1029_s21, 32, %s1031_s1, [#allocation3]  }
 0xfa1   :  { %1237 = dma.done.wait [#allocation3], 32  }
 0xfa2   :  { %1238 = vsyncadd [#allocation3], 4294967264 }
 0xfa3   :  { %1038 = vsyncpa [#allocation3], 1 }

</bundles_post_ra>
